<compile_context>
chip_gen: v5e
topology: v5e:2x2
jax: 0.10.0
libtpu: 0.0.40
codegen_flags: <defaults>
</compile_context>

<pallas_src>
import functools

import jax
import jax.numpy as jnp
from jax.experimental import pallas as pl
from jax.experimental.pallas import tpu as pltpu


def _round_up(n, m):
    return ((n + m - 1) // m) * m


_DEV_INFO = None


def _device_info():
    """Best-effort TPU introspection: (vmem_capacity_bytes, default row tile)."""
    global _DEV_INFO
    if _DEV_INFO is not None:
        return _DEV_INFO
    vmem_cap = 64 << 20          # conservative fallback (v7x physical VMEM)
    tm_default = 512             # v6e/v7x need ~600 flops per weight byte
    kind = ""
    try:
        kind = jax.devices()[0].device_kind.lower()
    except Exception:
        pass
    try:
        cap = int(getattr(pltpu.get_tpu_info(), "vmem_capacity_bytes", 0) or 0)
        if cap > 0:
            vmem_cap = cap
    except Exception:
        # Heuristic: every generation before v7x has 128 MiB of VMEM.
        if kind and "7" not in kind:
            vmem_cap = 128 << 20
    if "v5e" in kind or "v5 lite" in kind or "v5lite" in kind:
        # v5e: 197 TF/s vs ~0.82 TB/s -> tm=256 already saturates the roofline;
        # spend the VMEM on a larger hidden block instead.
        tm_default = 256
    _DEV_INFO = (vmem_cap, tm_default)
    return _DEV_INFO


def _swiglu_ffn_kernel(x_ref, w12_ref, b12_ref, w3_ref, b3_ref, o_ref, acc_ref, *, tc):
    """Grid = (row_blocks, hidden_blocks); hidden axis is the reduction (last).

    w12_ref (hidden-block dim squeezed) has columns laid out as
    [gate_0 | value_0 | gate_1 | value_1 | ...] sub-chunks of width `tc`, so each
    sub-chunk is a single fused MXU pass and the SiLU of chunk j can overlap
    with the MXU work of neighbouring chunks within one grid step.
    """
    th = w3_ref.shape[0]
    n_sub = th // tc

    @pl.when(pl.program_id(1) == 0)
    def _init():
        acc_ref[...] = jnp.zeros_like(acc_ref)

    x = x_ref[...]                                                   # (TM, Dp)
    for j in range(n_sub):                       # static unroll; n_sub is small
        c0 = j * 2 * tc
        x12 = jnp.dot(x, w12_ref[:, c0:c0 + 2 * tc],
                      preferred_element_type=jnp.float32) \
            + b12_ref[:, c0:c0 + 2 * tc]                             # (TM, 2*tc)
        x1 = x12[:, :tc]                                             # gate
        x2 = x12[:, tc:]                                             # value
        # sigmoid = 1 / (1 + exp(-x1)) via EUP exp + approx reciprocal (keeps
        # VALU slots free; accuracy well within tolerance).
        sig = pl.reciprocal(1.0 + jnp.exp(-x1), approx=True)
        # Cast back to the weight dtype so bf16 weights hit the fast MXU path;
        # accumulation stays f32 via preferred_element_type.
        hidden = (x1 * sig * x2).astype(w3_ref.dtype)
        acc_ref[...] += jnp.dot(hidden, w3_ref[j * tc:(j + 1) * tc, :],
                                preferred_element_type=jnp.float32)

    @pl.when(pl.program_id(1) == pl.num_programs(1) - 1)
    def _finalize():
        o_ref[...] = (acc_ref[...] + b3_ref[...]).astype(o_ref.dtype)


def _derive_th(dp, op, hp0, wsz, xsz, vmem_budget, tm):
    """Largest hidden block whose double-buffered tile plan fits the budget."""
    fixed = (2 * tm * dp * xsz      # x tile (double-buffered)
             + 2 * tm * op * xsz    # out tile (double-buffered)
             + tm * op * 4          # f32 accumulator scratch
             + 2 * op * wsz         # b3
             + (4 << 20))           # intermediates + compiler internal scratch
    per_th = 2 * wsz * (2 * dp + op) + 4 * wsz   # w12 + w3 + b12 blocks (x2 bufs)
    avail = vmem_budget - fixed
    if avail <= per_th * 128:
        return 128
    th = int(avail // per_th)
    th = min(th, hp0, 2048)
    if th >= 256:
        th = (th // 256) * 256
    else:
        th = 128
    return th


def prepare_swiglu_params(w12, b12, w3, b3, *, th=None, tc=256, tm_hint=None):
    """One-time (init-time) weight preparation — NOT in the per-call hot path.

    * Transposes weights into matmul-friendly (K, N) layouts, pads every feature
      dim to a multiple of 128 (lane-dense).
    * Derives the hidden block width `th` from the device's VMEM budget (unless
      overridden) and interleaves gate/value weights+biases at sub-chunk
      granularity `tc` so the kernel does one fused MXU pass per sub-chunk.
    * Stores the fused W12 as a contiguous (n_h, Dp, 2*th) array so each hidden
      block is a single contiguous DMA.
    """
    two_h, d_in = w12.shape
    assert two_h % 2 == 0
    h = two_h // 2
    d_out, h2 = w3.shape
    assert h2 == h
    if b12 is None:
        b12 = jnp.zeros((two_h,), w12.dtype)
    if b3 is None:
        b3 = jnp.zeros((d_out,), w3.dtype)

    dp = _round_up(d_in, 128)
    op = _round_up(d_out, 128)
    hp0 = _round_up(h, 128)

    vmem_cap, tm_default = _device_info()
    if tm_hint is None:
        tm_hint = tm_default
    if th is None:
        th = _derive_th(dp, op, hp0, w12.dtype.itemsize, 4,
                        vmem_cap * 13 // 16, tm_hint)
    th = int(min(max(th, 128), hp0))
    assert th % 128 == 0, "hidden block size must be a multiple of 128"
    tc_eff = 256 if (tc >= 256 and th % 256 == 0) else 128
    tc_eff = min(tc_eff, th)
    n_sub = th // tc_eff
    hp = _round_up(hp0, th)
    n_h = hp // th

    def pad2(a, rows, cols):
        return jnp.pad(a, ((0, rows - a.shape[0]), (0, cols - a.shape[1])))

    w1_t = pad2(jnp.transpose(w12[:h]), dp, hp)            # (Dp, Hp) gate
    w2_t = pad2(jnp.transpose(w12[h:]), dp, hp)            # (Dp, Hp) value
    g = w1_t.reshape(dp, n_h, n_sub, tc_eff)
    v = w2_t.reshape(dp, n_h, n_sub, tc_eff)
    # Columns per hidden block: [g_0 | v_0 | g_1 | v_1 | ...], chunks of width tc.
    w12_f = jnp.stack([g, v], axis=3).reshape(dp, n_h, 2 * th)
    w12_f = jnp.transpose(w12_f, (1, 0, 2))                 # (n_h, Dp, 2*th)

    b1 = jnp.pad(b12[:h], (0, hp - h)).reshape(n_h, n_sub, tc_eff)
    b2 = jnp.pad(b12[h:], (0, hp - h)).reshape(n_h, n_sub, tc_eff)
    b12_f = jnp.stack([b1, b2], axis=2).reshape(n_h, 1, 2 * th)

    w3_t = pad2(jnp.transpose(w3), hp, op)                  # (Hp, Op) row-contiguous blocks
    b3_p = jnp.pad(b3, (0, op - d_out)).reshape(1, op)

    meta = dict(d_in=d_in, d_out=d_out, dp=dp, hp=hp, op=op,
                th=th, n_h=n_h, tc=tc_eff, n_sub=n_sub)
    return (w12_f, b12_f, w3_t, b3_p), meta


def swiglu_ffn_pallas(x, params, meta, *, tm=None):
    """x: (B, S, D_in); params/meta from prepare_swiglu_params."""
    B, S, d_in = x.shape
    assert d_in == meta["d_in"]
    dp, hp, op = meta["dp"], meta["hp"], meta["op"]
    th, n_h, tc = meta["th"], meta["n_h"], meta["tc"]
    d_out = meta["d_out"]
    w12_f, b12_f, w3_t, b3_p = params

    vmem_cap, tm_default = _device_info()
    budget = vmem_cap * 13 // 16          # leave headroom for internal scratch
    if tm is None:
        tm = tm_default
    assert tm % 128 == 0, "row tile must be a multiple of 128"

    xsz = x.dtype.itemsize
    wsz = w12_f.dtype.itemsize

    def plan_bytes(tm_e):
        return (2 * tm_e * dp * xsz          # x tile (double-buffered)
                + 2 * tm_e * op * xsz        # out tile (double-buffered)
                + 2 * dp * 2 * th * wsz      # fused w12 hidden block
                + 2 * 2 * th * wsz           # fused b12 block
                + 2 * th * op * wsz          # w3 hidden block
                + 2 * op * wsz               # b3
                + tm_e * op * 4              # f32 accumulator scratch
                + tm_e * tc * 12             # x12/hidden sub-chunk intermediates
                + (2 << 20))                 # slack

    M = B * S
    row_gran = 8 if xsz >= 4 else 16         # sublane granularity (f32 / bf16)
    tm_eff = min(tm, _round_up(M, row_gran))
    # th is baked into the prepared weights, so tm is the call-time knob used to
    # keep the resident plan inside the per-generation VMEM budget.
    while tm_eff > 128 and plan_bytes(tm_eff) > budget:
        tm_eff = max(128, _round_up(tm_eff // 2, row_gran))
    mp = _round_up(M, tm_eff)
    n_m = mp // tm_eff
    # Give both v7x TensorCores work on small-M calls: when n_h == 1 the weight
    # block index is grid-invariant (no re-fetch), so this split is ~free on
    # single-TC chips too.
    if n_m == 1 and n_h == 1 and M >= 256:
        tm_eff = _round_up((M + 1) // 2, row_gran)
        mp = _round_up(M, tm_eff)
        n_m = mp // tm_eff

    x2d = x.reshape(M, d_in)
    if (mp, dp) != (M, d_in):                # pad only when misaligned
        x2d = jnp.pad(x2d, ((0, mp - M), (0, dp - d_in)))

    vmem_limit = int(min(max(plan_bytes(tm_eff) * 5 // 4, 32 << 20), budget))

    kernel = functools.partial(_swiglu_ffn_kernel, tc=tc)

    grid_spec = pltpu.PrefetchScalarGridSpec(
        num_scalar_prefetch=0,
        grid=(n_m, n_h),                     # rows parallel, hidden reduction last
        in_specs=[
            pl.BlockSpec((tm_eff, dp), lambda m, h: (m, 0)),            # x tile
            pl.BlockSpec((None, dp, 2 * th), lambda m, h: (h, 0, 0)),   # fused w12 block (contiguous)
            pl.BlockSpec((None, 1, 2 * th), lambda m, h: (h, 0, 0)),    # fused b12 block
            pl.BlockSpec((th, op), lambda m, h: (h, 0)),                # w3 block (row-contiguous)
            pl.BlockSpec((1, op), lambda m, h: (0, 0)),                 # b3
        ],
        out_specs=pl.BlockSpec((tm_eff, op), lambda m, h: (m, 0)),
        scratch_shapes=[pltpu.VMEM((tm_eff, op), jnp.float32)],
    )
    out2d = pl.pallas_call(
        kernel,
        out_shape=jax.ShapeDtypeStruct((mp, op), x.dtype),
        grid_spec=grid_spec,
        compiler_params=pltpu.CompilerParams(
            dimension_semantics=("parallel", "arbitrary"),
            vmem_limit_bytes=vmem_limit),
    )(x2d, w12_f, b12_f, w3_t, b3_p)

    return out2d[:M, :d_out].reshape(B, S, d_out)


def swiglu_ffn_ref(x, w12, b12, w3, b3):
    """Pure-JAX reference mirroring the PyTorch forward exactly."""
    hi = jax.lax.Precision.HIGHEST
    x = x.astype(jnp.float32)
    w12 = w12.astype(jnp.float32)
    w3 = w3.astype(jnp.float32)
    x12 = jnp.einsum("bsd,hd->bsh", x, w12, precision=hi) + b12.astype(jnp.float32)
    x1, x2 = jnp.split(x12, 2, axis=-1)
    hidden = jax.nn.silu(x1) * x2
    return jnp.einsum("bsh,oh->bso", hidden, w3, precision=hi) + b3.astype(jnp.float32)


def _make_params(key, d_in, h, d_out, dtype=jnp.float32):
    k1, k2, k3, k4 = jax.random.split(key, 4)
    w12 = (jax.random.uniform(k1, (2 * h, d_in), jnp.float32, -1.0, 1.0) / jnp.sqrt(d_in)).astype(dtype)
    b12 = (jax.random.uniform(k2, (2 * h,), jnp.float32, -1.0, 1.0) / jnp.sqrt(d_in)).astype(dtype)
    w3 = (jax.random.uniform(k3, (d_out, h), jnp.float32, -1.0, 1.0) / jnp.sqrt(h)).astype(dtype)
    b3 = (jax.random.uniform(k4, (d_out,), jnp.float32, -1.0, 1.0) / jnp.sqrt(h)).astype(dtype)
    return w12, b12, w3, b3


def _check(out, ref, tag, atol=1e-2, rtol=1e-2):
    out = jnp.asarray(out, jnp.float32)
    ref = jnp.asarray(ref, jnp.float32)
    assert out.shape == ref.shape, (tag, out.shape, ref.shape)
    err = jnp.max(jnp.abs(out - ref))
    assert jnp.allclose(out, ref, atol=atol, rtol=rtol), f"{tag}: max abs err {err}"


if __name__ == "__main__":
    key = jax.random.PRNGKey(0)

    # --- Test 1: lane-aligned config, derived th, default (device-aware) tm;
    # M=256 exercises the 2-row-block split for TC parallelism. ---
    kx, kp, key = jax.random.split(key, 3)
    d_in, h, d_out, B, S = 128, 256, 128, 2, 128
    x = jax.random.normal(kx, (B, S, d_in), dtype=jnp.float32)
    w12, b12, w3, b3 = _make_params(kp, d_in, h, d_out)
    params, meta = prepare_swiglu_params(w12, b12, w3, b3)
    out = jax.block_until_ready(swiglu_ffn_pallas(x, params, meta))
    _check(out, swiglu_ffn_ref(x, w12, b12, w3, b3), "aligned/derived-th")

    # --- Test 2: small tiles -> multiple row blocks AND multiple hidden
    # (reduction) blocks; exercises the accumulator / pl.when path. ---
    params2, meta2 = prepare_swiglu_params(w12, b12, w3, b3, th=128)
    out2 = jax.block_until_ready(swiglu_ffn_pallas(x, params2, meta2, tm=128))
    _check(out2, swiglu_ffn_ref(x, w12, b12, w3, b3), "tiled/tm128-th128")

    # --- Test 3: tiny, non-128-aligned module config (feature padding + sublane-
    # granular row padding: M=16 rows, not 128). ---
    kx2, kp2, key = jax.random.split(key, 3)
    d_in, h, d_out, B, S = 32, 64, 32, 2, 8
    x3 = jax.random.normal(kx2, (B, S, d_in), dtype=jnp.float32)
    w12, b12, w3, b3 = _make_params(kp2, d_in, h, d_out)
    params3, meta3 = prepare_swiglu_params(w12, b12, w3, b3)
    out3 = jax.block_until_ready(swiglu_ffn_pallas(x3, params3, meta3))
    _check(out3, swiglu_ffn_ref(x3, w12, b12, w3, b3), "tiny/padded")

    # --- Test 4: bf16 weights/activations, th=512 -> two tc=256 sub-chunks per
    # grid step (exercises the in-kernel sub-tiling / MXU-VPU overlap path). ---
    kx3, kp3, key = jax.random.split(key, 3)
    d_in, h, d_out, B, S = 256, 512, 256, 2, 64
    x4 = jax.random.normal(kx3, (B, S, d_in), dtype=jnp.float32).astype(jnp.bfloat16)
    w12, b12, w3, b3 = _make_params(kp3, d_in, h, d_out, dtype=jnp.bfloat16)
    params4, meta4 = prepare_swiglu_params(w12, b12, w3, b3, th=512)
    out4 = jax.block_until_ready(swiglu_ffn_pallas(x4, params4, meta4))
    _check(out4, swiglu_ffn_ref(x4, w12, b12, w3, b3), "bf16/subchunked",
           atol=3e-2, rtol=3e-2)

    # TODO(synk): dynamic sub-network index selection (get_index/set_index) is a
    # weight-slicing mechanism outside the hot path; only the full-width forward
    # is implemented here (slice the weights before prepare_swiglu_params).
    print("KERNEL_OK")
</pallas_src>

<mosaic_0001>
module attributes {stable_mosaic.version = 11 : i64} {
  func.func @_swiglu_ffn_kernel(%arg0: i32, %arg1: i32, %arg2: memref<128x128xf32, #tpu.memory_space<vmem>>, %arg3: memref<1x128x512xf32, #tpu.memory_space<vmem>>, %arg4: memref<1x1x512xf32, #tpu.memory_space<vmem>>, %arg5: memref<256x128xf32, #tpu.memory_space<vmem>>, %arg6: memref<1x128xf32, #tpu.memory_space<vmem>>, %arg7: memref<128x128xf32, #tpu.memory_space<vmem>>, %arg8: memref<128x128xf32, #tpu.memory_space<vmem>>) attributes {dimension_semantics = [#tpu.dimension_semantics<parallel>, #tpu.dimension_semantics<arbitrary>], iteration_bounds = array<i64: 2, 1>, scalar_prefetch = 0 : i64, scratch_operands = 1 : i64, tpu.core_type = #tpu.core_type<tc>, window_params = [{transform_indices = @transform_0, window_bounds = array<i64: 128, 128>}, {transform_indices = @transform_1, window_bounds = array<i64: 1, 128, 512>}, {transform_indices = @transform_2, window_bounds = array<i64: 1, 1, 512>}, {transform_indices = @transform_3, window_bounds = array<i64: 256, 128>}, {pipeline_mode = #tpu.pipeline_mode<synchronous>, transform_indices = @transform_4, window_bounds = array<i64: 1, 128>}, {transform_indices = @transform_5, window_bounds = array<i64: 128, 128>}]} {
    %c0_i32 = arith.constant 0 : i32
    %0 = arith.cmpi eq, %arg1, %c0_i32 : i32
    %1 = arith.extui %0 : i1 to i32
    %c0_i32_0 = arith.constant 0 : i32
    %2 = arith.cmpi ne, %1, %c0_i32_0 : i32
    scf.if %2 {
      %cst_19 = arith.constant 0.000000e+00 : f32
      %29 = vector.broadcast %cst_19 : f32 to vector<128x128xf32>
      %c0_20 = arith.constant 0 : index
      %c0_21 = arith.constant 0 : index
      %30 = vector.load %arg8[%c0_20, %c0_21] : memref<128x128xf32, #tpu.memory_space<vmem>>, vector<128x128xf32>
      tpu.vector_store %arg8[%c0_20, %c0_21], %29 {strides = array<i32>} : memref<128x128xf32, #tpu.memory_space<vmem>>, vector<128x128xf32>,
    } else {
    }
    %c0 = arith.constant 0 : index
    %c0_1 = arith.constant 0 : index
    %3 = vector.load %arg2[%c0, %c0_1] : memref<128x128xf32, #tpu.memory_space<vmem>>, vector<128x128xf32>
    %c0_2 = arith.constant 0 : index
    %c0_3 = arith.constant 0 : index
    %c0_4 = arith.constant 0 : index
    %4 = vector.load %arg3[%c0_2, %c0_3, %c0_4] : memref<1x128x512xf32, #tpu.memory_space<vmem>>, vector<1x128x512xf32>
    %5 = vector.shape_cast %4 : vector<1x128x512xf32> to vector<128x512xf32>
    %cst = arith.constant dense<0.000000e+00> : vector<128x512xf32>
    %6 = tpu.matmul %3, %5, %cst {dimension_numbers = #tpu.dot_dimension_numbers<[1], [0], [0], [1], [0, 0, 1, 1], [], []>} : vector<128x128xf32>, vector<128x512xf32>, vector<128x512xf32> -> vector<128x512xf32>
    %c0_5 = arith.constant 0 : index
    %c0_6 = arith.constant 0 : index
    %c0_7 = arith.constant 0 : index
    %7 = vector.load %arg4[%c0_5, %c0_6, %c0_7] : memref<1x1x512xf32, #tpu.memory_space<vmem>>, vector<1x1x512xf32>
    %8 = vector.shape_cast %7 : vector<1x1x512xf32> to vector<1x512xf32>
    %9 = vector.broadcast %8 : vector<1x512xf32> to vector<128x512xf32>
    %10 = arith.addf %6, %9 : vector<128x512xf32>
    %11 = vector.extract_strided_slice %10 {offsets = [0, 0], sizes = [128, 256], strides = [1, 1]} : vector<128x512xf32> to vector<128x256xf32>
    %12 = vector.extract_strided_slice %10 {offsets = [0, 256], sizes = [128, 256], strides = [1, 1]} : vector<128x512xf32> to vector<128x256xf32>
    %cst_8 = arith.constant 0.000000e+00 : f32
    %13 = vector.broadcast %cst_8 : f32 to vector<128x256xf32>
    %14 = arith.subf %13, %11 : vector<128x256xf32>
    %15 = math.exp %14 : vector<128x256xf32>
    %cst_9 = arith.constant 1.000000e+00 : f32
    %16 = vector.broadcast %cst_9 : f32 to vector<128x256xf32>
    %17 = arith.addf %16, %15 : vector<128x256xf32>
    %18 = tpu.reciprocal %17 {approx = true} : vector<128x256xf32> -> vector<128x256xf32>
    %19 = arith.mulf %11, %18 : vector<128x256xf32>
    %20 = arith.mulf %19, %12 : vector<128x256xf32>
    %c0_10 = arith.constant 0 : index
    %c0_11 = arith.constant 0 : index
    %21 = vector.load %arg8[%c0_10, %c0_11] : memref<128x128xf32, #tpu.memory_space<vmem>>, vector<128x128xf32>
    %c0_12 = arith.constant 0 : index
    %c0_13 = arith.constant 0 : index
    %22 = vector.load %arg5[%c0_12, %c0_13] : memref<256x128xf32, #tpu.memory_space<vmem>>, vector<256x128xf32>
    %cst_14 = arith.constant dense<0.000000e+00> : vector<128x128xf32>
    %23 = tpu.matmul %20, %22, %cst_14 {dimension_numbers = #tpu.dot_dimension_numbers<[1], [0], [0], [1], [0, 0, 1, 1], [], []>} : vector<128x256xf32>, vector<256x128xf32>, vector<128x128xf32> -> vector<128x128xf32>
    %24 = arith.addf %21, %23 : vector<128x128xf32>
    %c0_15 = arith.constant 0 : index
    %c0_16 = arith.constant 0 : index
    %25 = vector.load %arg8[%c0_15, %c0_16] : memref<128x128xf32, #tpu.memory_space<vmem>>, vector<128x128xf32>
    tpu.vector_store %arg8[%c0_15, %c0_16], %24 {strides = array<i32>} : memref<128x128xf32, #tpu.memory_space<vmem>>, vector<128x128xf32>,
    %c0_i32_17 = arith.constant 0 : i32
    %26 = arith.cmpi eq, %arg1, %c0_i32_17 : i32
    %27 = arith.extui %26 : i1 to i32
    %c0_i32_18 = arith.constant 0 : i32
    %28 = arith.cmpi ne, %27, %c0_i32_18 : i32
    scf.if %28 {
      %c0_19 = arith.constant 0 : index
      %c0_20 = arith.constant 0 : index
      %29 = vector.load %arg8[%c0_19, %c0_20] : memref<128x128xf32, #tpu.memory_space<vmem>>, vector<128x128xf32>
      %c0_21 = arith.constant 0 : index
      %c0_22 = arith.constant 0 : index
      %30 = vector.load %arg6[%c0_21, %c0_22] : memref<1x128xf32, #tpu.memory_space<vmem>>, vector<1x128xf32>
      %31 = vector.broadcast %30 : vector<1x128xf32> to vector<128x128xf32>
      %32 = arith.addf %29, %31 : vector<128x128xf32>
      %c0_23 = arith.constant 0 : index
      %c0_24 = arith.constant 0 : index
      %33 = vector.load %arg7[%c0_23, %c0_24] : memref<128x128xf32, #tpu.memory_space<vmem>>, vector<128x128xf32>
      tpu.vector_store %arg7[%c0_23, %c0_24], %32 {strides = array<i32>} : memref<128x128xf32, #tpu.memory_space<vmem>>, vector<128x128xf32>,
    } else {
    }
    return
  }
  func.func @transform_0(%arg0: i32, %arg1: i32) -> (i32, i32) {
    %c0_i32 = arith.constant 0 : i32
    %c0_i32_0 = arith.constant 0 : i32
    return %arg0, %c0_i32 : i32, i32
  }
  func.func @transform_1(%arg0: i32, %arg1: i32) -> (i32, i32, i32) {
    %c0_i32 = arith.constant 0 : i32
    %c0_i32_0 = arith.constant 0 : i32
    %c0_i32_1 = arith.constant 0 : i32
    return %arg1, %c0_i32, %c0_i32_0 : i32, i32, i32
  }
  func.func @transform_2(%arg0: i32, %arg1: i32) -> (i32, i32, i32) {
    %c0_i32 = arith.constant 0 : i32
    %c0_i32_0 = arith.constant 0 : i32
    %c0_i32_1 = arith.constant 0 : i32
    return %arg1, %c0_i32, %c0_i32_0 : i32, i32, i32
  }
  func.func @transform_3(%arg0: i32, %arg1: i32) -> (i32, i32) {
    %c0_i32 = arith.constant 0 : i32
    %c0_i32_0 = arith.constant 0 : i32
    return %arg1, %c0_i32 : i32, i32
  }
  func.func @transform_4(%arg0: i32, %arg1: i32) -> (i32, i32) {
    %c0_i32 = arith.constant 0 : i32
    %c0_i32_0 = arith.constant 0 : i32
    %c0_i32_1 = arith.constant 0 : i32
    return %c0_i32, %c0_i32_0 : i32, i32
  }
  func.func @transform_5(%arg0: i32, %arg1: i32) -> (i32, i32) {
    %c0_i32 = arith.constant 0 : i32
    %c0_i32_0 = arith.constant 0 : i32
    return %arg0, %c0_i32 : i32, i32
  }
}

</mosaic_0001>

<bundles_post_ra>
// kernel: tpu_custom_call.1
= control target key start
LH: loop header
LB: loop body
LE: loop exit
PB: predicated region body
PF: predicated region fallthrough
CT: control target
= control target key end

     0   :  { %s2367_s0 = inlined_call_operand.hbm [shape: f32[256,128], index: 0, kind: input, shape index: {}]   ;;  %s2368_s1 = inlined_call_operand.hbm [shape: f32[1,128,512], index: 1, kind: input, shape index: {}]   ;;  %s2369_s2 = inlined_call_operand.hbm [shape: f32[1,1,512], index: 2, kind: input, shape index: {}]   ;;  %s2370_s3 = inlined_call_operand.hbm [shape: f32[256,128], index: 3, kind: input, shape index: {}]   ;;  %s2371_s4 = inlined_call_operand.vmem [shape: f32[1,128], index: 4, kind: input, shape index: {}]   ;;  %s2372_s5 = inlined_call_operand.hbm [shape: f32[256,128], index: 5, kind: output, shape index: {}]  }
   0x1   :  { %2375 = sst [smem:[#allocation16_spill]] %s2368_s1 }
   0x2   :  { %2376 = sst [smem:[#allocation17_spill]] %s2369_s2 }
   0x3   :  { %2377 = sst [smem:[#allocation18_spill]] %s2370_s3 }
   0x4   :  { %10 = vsyncpa [#allocation4], 0 }
   0x5   :  { %12 = vsyncpa [#allocation4 + $0x1], 0 }
   0x6   :  { %13 = vsyncpa [#allocation7], 0 }
   0x7   :  { %14 = vsyncpa [#allocation10], 0 }
   0x8   :  { %15 = vsyncpa [#allocation5], 0 }
   0x9   :  { %17 = vsyncpa [#allocation5 + $0x1], 0  ;;  %s1856_s18 = smov 0   ;;  %s1858_s19 = smov 0  }
   0xa   :  { %s1860_s20 = smov 0   ;;  %s1862_s21 = smov 0  }
   0xb   :  { %s1864_s22 = smov 0   ;;  %s1866_s23 = smov 0  }
   0xc LB: > { %s1322_s24 = sadd.s32 4294967295, %s1815_s23   ;;  %s1323_s25 = sadd.s32 4294967294, %s1815_s23   ;;  %s1815_s23 = sphi %s1866_s23, %s23_s23   ;;  %s1811_s22 = sphi %s1864_s22, %s2395_s22   ;;  %s1807_s21 = sphi %s1862_s21, %s2394_s21   ;;  %s1803_s20 = sphi %s1860_s20, %s2393_s20   ;;  %s1799_s19 = sphi %s1858_s19, %s2392_s19   ;;  %s1795_s18 = sphi %s1856_s18, %s2391_s18  }
   0xd   : > { %p55_p0 = scmp.ne.s32.totalorder %s1799_s19, %s1795_s18  ;;  %p1890_p1 = scmp.eq.s32.totalorder %s1322_s24, 0 }
   0xe   : > { %p1894_p2 = scmp.eq.s32.totalorder %s1322_s24, 1  ;;  %p184_p3 = scmp.eq.s32.totalorder %s1323_s25, 1 }
   0xf   : > { %p1900_p4 = por %p1890_p1, %p55_p0  ;;  %p1324_p5 = scmp.ge.s32.totalorder %s1815_s23, 1 }
  0x10   : > { %p1905_p6 = por %p184_p3, %p55_p0  ;;  %p191_p7 = scmp.lt.s32.totalorder %s1815_s23, 3 }
  0x11   : > { %s2382_s1 = sld [smem:[#allocation16_spill]]  ;;  %s1817_s9 = smov [#allocation6]  }
  0x12   : > { %p1913_p8 = pnand %p1324_p5, %p191_p7  ;;  %s207_s10 = sshll.u32 %s1817_s9, 4  ;;  %s208_s10 = int_to_ptr.vmem [resolvable:$true] %s207_s10 }
  0x13   : > { %p1328_p11 = scmp.ge.s32.totalorder %s1815_s23, 2  ;;  %s2385_s2 = sld [smem:[#allocation17_spill]] }
  0x14   : > { %p1393_p9 = pneg %p1913_p8  ;;  %s1818_s15 = smov 512  }
  0x15   : > { %s1819_s16 = smov 32   ;;  %s1820_s17 = smov [#allocation8]  }
  0x16   : > { %p1921_p10 = pnand %p1393_p9, %p1890_p1  ;;  %s224_s24 = sshll.u32 %s1820_s17, 4  ;;  %s225_s24 = int_to_ptr.vmem [resolvable:$true] %s224_s24 }
  0x17   : > { %s205_s7 = sshll.u32 %s2382_s1, 4  ;;  %s2386_s3 = sld [smem:[#allocation18_spill]]  ;;  %s206_s7 = int_to_ptr.hbm [resolvable:$true] %s205_s7 }
  0x18   : > { %1396 = dma.hbm_to_vmem [thread:$0]  (!%p1921_p10), %s206_s7, 8192, %s208_s10, [#allocation7], %s1818_s15, %s1818_s15, %s1819_s16  }
  0x19   : > { %s222_s14 = sshll.u32 %s2385_s2, 4  ;;  %s1821_s9 = smov [#allocation9]   ;;  %s223_s14 = int_to_ptr.hbm [resolvable:$true] %s222_s14 }
  0x1a   : > { %1399 = dma.hbm_to_vmem [thread:$0]  (!%p1921_p10), %s223_s14, 64, %s225_s24, [#allocation7]  }
  0x1b   : > { %s238_s12 = sshll.u32 %s1821_s9, 4  ;;  %s2373_s13 = smov 128   ;;  %s239_s12 = int_to_ptr.vmem [resolvable:$true] %s238_s12 }
  0x1c   : > { %s2374_s7 = smov 8   ;;  %s42_s10 = sadd.s32 1, %s1803_s20 }
  0x1d   : > { %s236_s6 = sshll.u32 %s2386_s3, 4  ;;  %s35_s15 = sadd.s32 1, %s1811_s22  ;;  %s237_s6 = int_to_ptr.hbm [resolvable:$true] %s236_s6 }
  0x1e   : > { %1402 = dma.hbm_to_vmem [thread:$0]  (!%p1921_p10), %s237_s6, 4096, %s239_s12, [#allocation10], %s2373_s13, %s2373_s13, %s2374_s7  }
  0x1f   : > { %p49_p12 = scmp.ne.s32.totalorder %s1803_s20, %s1799_s19  ;;  %p37_p13 = scmp.ge.s32.totalorder %s35_s15, 2 }
  0x20   : > { %p50_p0 = scmp.eq.s32.totalorder %s1815_s23, 0  ;;  %p1414_p5 = scmp.lt.s32.totalorder %s1815_s23, 2 }
  0x21   : > { %p1948_p3 = por %p1894_p2, %p49_p12  ;;  %s2397_s15 = smov (%p37_p13, %s35_s15), 0 }
  0x22   : > { %p1955_p7 = por %p50_p0, %p49_p12  ;;  %s255_s16 = sand.u32 1, %s1803_s20  }
  0x23   : > { %s39_s17 = ssub.s32 %s1811_s22, %s2397_s15  ;;  %s1329_s24 = sshll.u32 %s255_s16, 7 }
  0x24   : > { %p40_p9 = scmp.eq.s32.totalorder %s39_s17, 0  ;;  %s1343_s25 = sshll.u32 %s1811_s22, 7 }
  0x25   : > { %s264_s9 = scalar_lea.hbm %s2367_s0, %s1343_s25  ;;  %s259_s12 = scalar_lea.vmem [#allocation3], %s1329_s24 }
  0x26   : > { %s1964_s27 = scalar_select %p40_p9, %s1803_s20, %s42_s10  }
  0x27   : > { %s267_s13 = sshll.u32 %s259_s12, 4  ;;  %s265_s7 = sshll.u32 %s264_s9, 4  ;;  %s268_s13 = int_to_ptr.vmem [resolvable:$true] %s267_s13  ;;  %s266_s7 = int_to_ptr.hbm [resolvable:$true] %s265_s7 }
  0x28   : > { %p1404_p2 = pnand %p1414_p5, %p1955_p7  ;;  %s256_s1 = scalar_lea.sflag [#allocation4], %s255_s16 }
  0x29   : > { %s2389_s2 = smov 8   ;;  %s2390_s3 = smov 128  }
  0x2a   : > { %1406 = dma.hbm_to_vmem [thread:$0]  (!%p1404_p2), %s266_s7, 2048, %s268_s13, %s256_s1, %s2390_s3, %s2390_s3, %s2389_s2  }
  0x2b   : > { %279 = sbr.rel (%p1913_p8) target bundleno = 539 (0x21b), region = 40  ;;  %s1979_s10 = sand.u32 (!%p1913_p8), 1, %s1799_s19  }
  0x2c   : > { %s1333_s17 = sshll.u32 (!%p1913_p8), %s1979_s10, 7  ;;  %s282_s24 = scalar_lea.sflag (!%p1913_p8), [#allocation4], %s1979_s10 }
  0x2d   : > { %s1985_s11 = scalar_lea.vmem (!%p1913_p8), [#allocation3], %s1333_s17 }
  0x30   : > { %1778 = dma.done.wait (%p1900_p4), %s282_s24, 2048  }
  0x31   : > { %1780 = vsyncadd (%p1900_p4), %s282_s24, 4294965248 }
  0x32   : > { %1782 = dma.done.wait (%p1890_p1), [#allocation7], 8256  }
  0x33   : > { %1784 = vsyncadd (%p1890_p1), [#allocation7], 4294959040 }
  0x34   : > { %1786 = dma.done.wait (%p1890_p1), [#allocation10], 4096  }
  0x35   : > { %1788 = vsyncadd (%p1890_p1), [#allocation10], 4294963200  ;;  %v427_v0 = vld [vmem:[#allocation6 + $0x1e0] sm:$0xff]  ;;  %v428_v1 = vld [vmem:[#allocation6 + $0x1e8] sm:$0xff]  ;;  %s2295_s3 = scalar_lea.vmem [#allocation11], %s1333_s17  ;;  %s1344_s26 = sshll.u32 %s1807_s21, 7 }
  0x36   : > { %v423_v2 = vld [vmem:[#allocation6 + $0x1c0] sm:$0xff]  ;;  %1345 = vmatpush.msra.mxu2 %v427_v0  ;;  %1361 = vmatpush.msra.mxu3 %v428_v1  ;;  %v424_v3 = vld [vmem:[#allocation6 + $0x1c8] sm:$0xff]  ;;  %v429_v33 = vld [vmem:[#allocation6 + $0x1f0] sm:$0xff]  ;;  %s1202_s13 = scalar_lea.hbm %s2372_s5, %s1344_s26  ;;  %s1203_s7 = sshll.u32 %s2295_s3, 4  ;;  %s1204_s7 = int_to_ptr.vmem [resolvable:$true] %s1203_s7 }
  0x37   : > { %v419_v4 = vld [vmem:[#allocation6 + $0x1a0] sm:$0xff]  ;;  %v420_v5 = vld [vmem:[#allocation6 + $0x1a8] sm:$0xff]  ;;  %441 = vmatpush.msra.mxu0 %v427_v0  ;;  %506 = vmatpush.msra.mxu1 %v428_v1  ;;  %v430_v34 = vld [vmem:[#allocation6 + $0x1f8] sm:$0xff]  ;;  %s1205_s16 = sshll.u32 %s1202_s13, 4  ;;  %s1191_s25 = scalar_lea.sflag [#allocation5], %s1979_s10  ;;  %s1206_s16 = int_to_ptr.hbm [resolvable:$true] %s1205_s16 }
  0x38   : > { %1346 = vmatpush.msra.mxu2 %v423_v2  ;;  %1362 = vmatpush.msra.mxu3 %v424_v3  ;;  %v415_v6 = vld [vmem:[#allocation6 + $0x180] sm:$0xff]  ;;  %v416_v7 = vld [vmem:[#allocation6 + $0x188] sm:$0xff]  ;;  %v425_v35 = vld [vmem:[#allocation6 + $0x1d0] sm:$0xff]  ;;  %s1739_s21 = sshra.s32 %s1206_s16, 4  ;;  %s1745_s12 = scalar_lea.hbm %s2372_s5, 256  ;;  %s1740_s21 = int_to_ptr.hbm [resolvable:$true] %s1739_s21 }
  0x39   : > { %442 = vmatpush.msra.mxu0 %v423_v2  ;;  %507 = vmatpush.msra.mxu1 %v424_v3  ;;  %v411_v8 = vld [vmem:[#allocation6 + $0x160] sm:$0xff]  ;;  %v412_v9 = vld [vmem:[#allocation6 + $0x168] sm:$0xff]  ;;  %v426_v36 = vld [vmem:[#allocation6 + $0x1d8] sm:$0xff]  ;;  %s1741_s30 = scalar_lea.hbm %s1740_s21, 128  ;;  %p1746_p10 = scmp.lt.s32.totalorder %s1740_s21, %s2372_s5 }
  0x3a   : > { %1347 = vmatpush.msra.mxu2 %v419_v4  ;;  %1363 = vmatpush.msra.mxu3 %v420_v5  ;;  %v407_v10 = vld [vmem:[#allocation6 + $0x140] sm:$0xff]  ;;  %v408_v11 = vld [vmem:[#allocation6 + $0x148] sm:$0xff]  ;;  %v421_v38 = vld [vmem:[#allocation6 + $0x1b0] sm:$0xff]  ;;  %p1742_p1 = scmp.ne.s32.totalorder %s1740_s21, %s1741_s30  ;;  %p1747_p12 = scmp.lt.s32.totalorder %s1745_s12, %s1741_s30 }
  0x3b   : > { %443 = vmatpush.msra.mxu0 %v419_v4  ;;  %508 = vmatpush.msra.mxu1 %v420_v5  ;;  %v403_v12 = vld [vmem:[#allocation6 + $0x120] sm:$0xff]  ;;  %v404_v13 = vld [vmem:[#allocation6 + $0x128] sm:$0xff]  ;;  %v422_v39 = vld [vmem:[#allocation6 + $0x1b8] sm:$0xff] }
  0x3c   : > { %1348 = vmatpush.msra.mxu2 %v415_v6  ;;  %1364 = vmatpush.msra.mxu3 %v416_v7  ;;  %v399_v14 = vld [vmem:[#allocation6 + $0x100] sm:$0xff]  ;;  %v400_v15 = vld [vmem:[#allocation6 + $0x108] sm:$0xff]  ;;  %v417_v40 = vld [vmem:[#allocation6 + $0x190] sm:$0xff]  ;;  %p1743_p4 = pnand %p1742_p1, %p1948_p3  ;;  %p1748_p13 = por %p1747_p12, %p1746_p10 }
  0x3d   : > { %444 = vmatpush.msra.mxu0 %v415_v6  ;;  %509 = vmatpush.msra.mxu1 %v416_v7  ;;  %v395_v16 = vld [vmem:[#allocation6 + $0xe0] sm:$0xff]  ;;  %v396_v17 = vld [vmem:[#allocation6 + $0xe8] sm:$0xff]  ;;  %v418_v41 = vld [vmem:[#allocation6 + $0x198] sm:$0xff] }
  0x3e   : > { %1349 = vmatpush.msra.mxu2 %v411_v8  ;;  %1365 = vmatpush.msra.mxu3 %v412_v9  ;;  %v391_v18 = vld [vmem:[#allocation6 + $0xc0] sm:$0xff]  ;;  %v392_v19 = vld [vmem:[#allocation6 + $0xc8] sm:$0xff]  ;;  %v413_v43 = vld [vmem:[#allocation6 + $0x170] sm:$0xff]  ;;  %p1744_p8 = pneg %p1743_p4 }
  0x3f   : > { %445 = vmatpush.msra.mxu0 %v411_v8  ;;  %510 = vmatpush.msra.mxu1 %v412_v9  ;;  %v387_v20 = vld [vmem:[#allocation6 + $0xa0] sm:$0xff]  ;;  %v388_v21 = vld [vmem:[#allocation6 + $0xa8] sm:$0xff]  ;;  %v414_v44 = vld [vmem:[#allocation6 + $0x178] sm:$0xff] }
  0x40   : > { %1350 = vmatpush.msra.mxu2 %v407_v10  ;;  %1366 = vmatpush.msra.mxu3 %v408_v11  ;;  %v383_v22 = vld [vmem:[#allocation6 + $0x80] sm:$0xff]  ;;  %v384_v23 = vld [vmem:[#allocation6 + $0x88] sm:$0xff]  ;;  %v409_v45 = vld [vmem:[#allocation6 + $0x150] sm:$0xff]  ;;  %p1749_p0 = pnand %p1748_p13, %p1744_p8 }
  0x41   : > { %446 = vmatpush.msra.mxu0 %v407_v10  ;;  %511 = vmatpush.msra.mxu1 %v408_v11  ;;  %v379_v24 = vld [vmem:[#allocation6 + $0x60] sm:$0xff]  ;;  %v380_v25 = vld [vmem:[#allocation6 + $0x68] sm:$0xff]  ;;  %v410_v46 = vld [vmem:[#allocation6 + $0x158] sm:$0xff] }
  0x42   : > { %1351 = vmatpush.msra.mxu2 %v403_v12  ;;  %1367 = vmatpush.msra.mxu3 %v404_v13  ;;  %v375_v26 = vld [vmem:[#allocation6 + $0x40] sm:$0xff]  ;;  %v376_v27 = vld [vmem:[#allocation6 + $0x48] sm:$0xff]  ;;  %v405_v48 = vld [vmem:[#allocation6 + $0x130] sm:$0xff] }
  0x43   : > { %447 = vmatpush.msra.mxu0 %v403_v12  ;;  %512 = vmatpush.msra.mxu1 %v404_v13  ;;  %v371_v28 = vld [vmem:[#allocation6 + $0x20] sm:$0xff]  ;;  %v372_v29 = vld [vmem:[#allocation6 + $0x28] sm:$0xff]  ;;  %v406_v49 = vld [vmem:[#allocation6 + $0x138] sm:$0xff] }
  0x44   : > { %1352 = vmatpush.msra.mxu2 %v399_v14  ;;  %1368 = vmatpush.msra.mxu3 %v400_v15  ;;  %v367_v30 = vld [vmem:[#allocation6] sm:$0xff]  ;;  %v368_v31 = vld [vmem:[#allocation6 + $0x8] sm:$0xff]  ;;  %v401_v50 = vld [vmem:[#allocation6 + $0x110] sm:$0xff] }
  0x45   : > { %448 = vmatpush.msra.mxu0 %v399_v14  ;;  %513 = vmatpush.msra.mxu1 %v400_v15  ;;  %v2000_v32 = vld [vmem:[%s1985_s11 + $0x40] sm:$0xff]  ;;  %v2010_v42 = vld [vmem:[%s1985_s11 + $0x48] sm:$0xff]  ;;  %v402_v51 = vld [vmem:[#allocation6 + $0x118] sm:$0xff] }
  0x46   : > { %1353 = vmatpush.msra.mxu2 %v395_v16  ;;  %1369 = vmatpush.msra.mxu3 %v396_v17  ;;  %v2005_v37 = vld [vmem:[%s1985_s11] sm:$0xff]  ;;  %v2015_v47 = vld [vmem:[%s1985_s11 + $0x8] sm:$0xff]  ;;  %v2020_v52 = vld [vmem:[%s1985_s11 + $0x50] sm:$0xff] }
  0x47   : > { %449 = vmatpush.msra.mxu0 %v395_v16  ;;  %514 = vmatpush.msra.mxu1 %v396_v17  ;;  %v397_v53 = vld [vmem:[#allocation6 + $0xf0] sm:$0xff]  ;;  %v398_v54 = vld [vmem:[#allocation6 + $0xf8] sm:$0xff]  ;;  %v2036_v8 = vld [vmem:[%s1985_s11 + $0x60] sm:$0xff] }
  0x48   : > { %1354 = vmatpush.msra.mxu2 %v391_v18  ;;  %1370 = vmatpush.msra.mxu3 %v392_v19  ;;  %v393_v55 = vld [vmem:[#allocation6 + $0xd0] sm:$0xff]  ;;  %v394_v56 = vld [vmem:[#allocation6 + $0xd8] sm:$0xff]  ;;  %v355_v9 = vld [vmem:[%s1985_s11 + $0x20] sm:$0xff] }
  0x49   : > { %450 = vmatpush.msra.mxu0 %v391_v18  ;;  %515 = vmatpush.msra.mxu1 %v392_v19  ;;  %v2025_v57 = vld [vmem:[%s1985_s11 + $0x10] sm:$0xff]  ;;  %v390_v59 = vld [vmem:[#allocation6 + $0xb8] sm:$0xff]  ;;  %v2042_v10 = vld [vmem:[%s1985_s11 + $0x68] sm:$0xff] }
  0x4a   : > { %1355 = vmatpush.msra.mxu2 %v387_v20  ;;  %1371 = vmatpush.msra.mxu3 %v388_v21  ;;  %v389_v58 = vld [vmem:[#allocation6 + $0xb0] sm:$0xff]  ;;  %v386_v61 = vld [vmem:[#allocation6 + $0x98] sm:$0xff]  ;;  %v356_v11 = vld [vmem:[%s1985_s11 + $0x28] sm:$0xff] }
  0x4b   : > { %451 = vmatpush.msra.mxu0 %v387_v20  ;;  %516 = vmatpush.msra.mxu1 %v388_v21  ;;  %v385_v60 = vld [vmem:[#allocation6 + $0x90] sm:$0xff]  ;;  %v2030_v62 = vld [vmem:[%s1985_s11 + $0x58] sm:$0xff]  ;;  %v2065_v18 = vld [vmem:[#allocation8] sm:$0xf] }
  0x4c   : > { %1356 = vmatpush.msra.mxu2 %v383_v22  ;;  %1372 = vmatpush.msra.mxu3 %v384_v23  ;;  %v381_v63 = vld [vmem:[#allocation6 + $0x70] sm:$0xff]  ;;  %v382_v0 = vld [vmem:[#allocation6 + $0x78] sm:$0xff]  ;;  %v2070_v19 = vperm.slane %v2065_v18, 0  ;;  %v2073_v20 = vperm.slane %v2065_v18, 1 }
  0x4d   : > { %452 = vmatpush.msra.mxu0 %v383_v22  ;;  %517 = vmatpush.msra.mxu1 %v384_v23  ;;  %v377_v1 = vld [vmem:[#allocation6 + $0x50] sm:$0xff]  ;;  %v378_v2 = vld [vmem:[#allocation6 + $0x58] sm:$0xff] }
  0x4e   : > { %1357 = vmatpush.msra.mxu2 %v379_v24  ;;  %1373 = vmatpush.msra.mxu3 %v380_v25  ;;  %v354_v3 = vld [vmem:[%s1985_s11 + $0x18] sm:$0xff]  ;;  %v373_v4 = vld [vmem:[#allocation6 + $0x30] sm:$0xff] }
  0x4f   : > { %453 = vmatpush.msra.mxu0 %v379_v24  ;;  %518 = vmatpush.msra.mxu1 %v380_v25  ;;  %v374_v5 = vld [vmem:[#allocation6 + $0x38] sm:$0xff]  ;;  %v369_v6 = vld [vmem:[#allocation6 + $0x10] sm:$0xff] }
  0x50   : > { %1358 = vmatpush.msra.mxu2 %v375_v26  ;;  %1374 = vmatpush.msra.mxu3 %v376_v27  ;;  %v370_v7 = vld [vmem:[#allocation6 + $0x18] sm:$0xff]  ;;  %v2048_v12 = vld [vmem:[%s1985_s11 + $0x70] sm:$0xff] }
  0x51   : > { %454 = vmatpush.msra.mxu0 %v375_v26  ;;  %519 = vmatpush.msra.mxu1 %v376_v27  ;;  %v357_v13 = vld [vmem:[%s1985_s11 + $0x30] sm:$0xff]  ;;  %v2054_v14 = vld [vmem:[%s1985_s11 + $0x78] sm:$0xff] }
  0x52   : > { %1359 = vmatpush.msra.mxu2 %v371_v28  ;;  %1375 = vmatpush.msra.mxu3 %v372_v29  ;;  %v358_v15 = vld [vmem:[%s1985_s11 + $0x38] sm:$0xff]  ;;  %v954_v27 = vld [vmem:[#allocation9 + $0x68] sm:$0xff] }
  0x53   : > { %455 = vmatpush.msra.mxu0 %v371_v28  ;;  %520 = vmatpush.msra.mxu1 %v372_v29  ;;  %v956_v16 = vld [vmem:[#allocation9 + $0x78] sm:$0xff]  ;;  %v955_v25 = vld [vmem:[#allocation9 + $0x70] sm:$0xff]  ;;  %v970_v28 = vld [vmem:[#allocation9 + $0xe8] sm:$0xff] }
  0x54   : > { %1360 = vmatpush.msra.mxu2 %v367_v30  ;;  %1376 = vmatpush.msra.mxu3 %v368_v31  ;;  %v972_v17 = vld [vmem:[#allocation9 + $0xf8] sm:$0xff]  ;;  %v971_v26 = vld [vmem:[#allocation9 + $0xf0] sm:$0xff] }
  0x55   : > { %481 = vmatmul.f32.vlgmr.msra.gmra.mxu2 %v2000_v32  ;;  %546 = vmatmul.f32.vlgmr.msra.gmra.mxu3 %v2000_v32 }
  0x56   : > { %571 = vmatpush.msrb.mxu2 %v429_v33  ;;  %636 = vmatpush.msrb.mxu3 %v430_v34  ;;  %v953_v33 = vld [vmem:[#allocation9 + $0x60] sm:$0xff] }
  0x57   : > { %456 = vmatpush.msra.mxu0 %v367_v30  ;;  %521 = vmatpush.msra.mxu1 %v368_v31  ;;  %v969_v34 = vld [vmem:[#allocation9 + $0xe0] sm:$0xff] }
  0x58   : > { %572 = vmatpush.msrb.mxu2 %v425_v35  ;;  %637 = vmatpush.msrb.mxu3 %v426_v36  ;;  %v952_v35 = vld [vmem:[#allocation9 + $0x58] sm:$0xff] }
  0x59   : > { %457 = vmatmul.f32.vlgmr.msra.gmra.mxu0 %v2005_v37  ;;  %522 = vmatmul.f32.vlgmr.msra.gmra.mxu1 %v2005_v37  ;;  %v968_v36 = vld [vmem:[#allocation9 + $0xd8] sm:$0xff] }
  0x5a   : > { %573 = vmatpush.msrb.mxu2 %v421_v38  ;;  %638 = vmatpush.msrb.mxu3 %v422_v39 }
  0x5b   : > { %973 = vmatpush.msrb.mxu0 %v956_v16  ;;  %1038 = vmatpush.msrb.mxu1 %v972_v17  ;;  %v942_v16 = vld [vmem:[#allocation9 + $0x8] sm:$0xff] }
  0x5c   : > { %574 = vmatpush.msrb.mxu2 %v417_v40  ;;  %639 = vmatpush.msrb.mxu3 %v418_v41  ;;  %v958_v17 = vld [vmem:[#allocation9 + $0x88] sm:$0xff] }
  0x5d   : > { %484 = vmatmul.f32.gmra.mxu2 %v2010_v42  ;;  %549 = vmatmul.f32.gmra.mxu3 %v2010_v42 }
  0x5e   : > { %575 = vmatpush.msrb.mxu2 %v413_v43  ;;  %640 = vmatpush.msrb.mxu3 %v414_v44  ;;  %v951_v43 = vld [vmem:[#allocation9 + $0x50] sm:$0xff] }
  0x5f   : > { %974 = vmatpush.msrb.mxu0 %v955_v25  ;;  %1039 = vmatpush.msrb.mxu1 %v971_v26  ;;  %v967_v44 = vld [vmem:[#allocation9 + $0xd0] sm:$0xff]  ;;  %v941_v25 = vld [vmem:[#allocation9] sm:$0xff] }
  0x60   : > { %576 = vmatpush.msrb.mxu2 %v409_v45  ;;  %641 = vmatpush.msrb.mxu3 %v410_v46  ;;  %v950_v45 = vld [vmem:[#allocation9 + $0x48] sm:$0xff]  ;;  %v957_v26 = vld [vmem:[#allocation9 + $0x80] sm:$0xff] }
  0x61   : > { %460 = vmatmul.f32.gmra.mxu0 %v2015_v47  ;;  %525 = vmatmul.f32.gmra.mxu1 %v2015_v47  ;;  %v966_v46 = vld [vmem:[#allocation9 + $0xc8] sm:$0xff] }
  0x62   : > { %577 = vmatpush.msrb.mxu2 %v405_v48  ;;  %642 = vmatpush.msrb.mxu3 %v406_v49  ;;  %v965_v48 = vld [vmem:[#allocation9 + $0xc0] sm:$0xff] }
  0x63   : > { %975 = vmatpush.msrb.mxu0 %v954_v27  ;;  %1040 = vmatpush.msrb.mxu1 %v970_v28 }
  0x64   : > { %578 = vmatpush.msrb.mxu2 %v401_v50  ;;  %643 = vmatpush.msrb.mxu3 %v402_v51 }
  0x65   : > { %487 = vmatmul.f32.gmra.mxu2 %v2020_v52  ;;  %552 = vmatmul.f32.gmra.mxu3 %v2020_v52 }
  0x66   : > { %579 = vmatpush.msrb.mxu2 %v397_v53  ;;  %644 = vmatpush.msrb.mxu3 %v398_v54  ;;  %v948_v53 = vld [vmem:[#allocation9 + $0x38] sm:$0xff] }
  0x67   : > { %976 = vmatpush.msrb.mxu0 %v953_v33  ;;  %1041 = vmatpush.msrb.mxu1 %v969_v34  ;;  %v964_v54 = vld [vmem:[#allocation9 + $0xb8] sm:$0xff] }
  0x68   : > { %580 = vmatpush.msrb.mxu2 %v393_v55  ;;  %645 = vmatpush.msrb.mxu3 %v394_v56 }
  0x69   : > { %463 = vmatmul.f32.gmra.mxu0 %v2025_v57  ;;  %528 = vmatmul.f32.gmra.mxu1 %v2025_v57 }
  0x6a   : > { %581 = vmatpush.msrb.mxu2 %v389_v58  ;;  %646 = vmatpush.msrb.mxu3 %v390_v59  ;;  %v963_v58 = vld [vmem:[#allocation9 + $0xb0] sm:$0xff]  ;;  %v946_v59 = vld [vmem:[#allocation9 + $0x28] sm:$0xff] }
  0x6b   : > { %977 = vmatpush.msrb.mxu0 %v952_v35  ;;  %1042 = vmatpush.msrb.mxu1 %v968_v36 }
  0x6c   : > { %582 = vmatpush.msrb.mxu2 %v385_v60  ;;  %647 = vmatpush.msrb.mxu3 %v386_v61  ;;  %v962_v60 = vld [vmem:[#allocation9 + $0xa8] sm:$0xff] }
  0x6d   : > { %490 = vmatmul.f32.gmra.mxu2 %v2030_v62  ;;  %555 = vmatmul.f32.gmra.mxu3 %v2030_v62 }
  0x6e   : > { %583 = vmatpush.msrb.mxu2 %v381_v63  ;;  %648 = vmatpush.msrb.mxu3 %v382_v0  ;;  %v961_v63 = vld [vmem:[#allocation9 + $0xa0] sm:$0xff] }
  0x6f   : > { %978 = vmatpush.msrb.mxu0 %v951_v43  ;;  %1043 = vmatpush.msrb.mxu1 %v967_v44 }
  0x70   : > { %584 = vmatpush.msrb.mxu2 %v377_v1  ;;  %649 = vmatpush.msrb.mxu3 %v378_v2 }
  0x71   : > { %466 = vmatmul.f32.gmra.mxu0 %v354_v3  ;;  %531 = vmatmul.f32.gmra.mxu1 %v354_v3 }
  0x72   : > { %585 = vmatpush.msrb.mxu2 %v373_v4  ;;  %650 = vmatpush.msrb.mxu3 %v374_v5  ;;  %v960_v4 = vld [vmem:[#allocation9 + $0x98] sm:$0xff] }
  0x73   : > { %979 = vmatpush.msrb.mxu0 %v950_v45  ;;  %1044 = vmatpush.msrb.mxu1 %v966_v46 }
  0x74   : > { %586 = vmatpush.msrb.mxu2 %v369_v6  ;;  %651 = vmatpush.msrb.mxu3 %v370_v7 }
  0x75   : > { %493 = vmatmul.f32.gmra.mxu2 %v2036_v8  ;;  %558 = vmatmul.f32.gmra.mxu3 %v2036_v8 }
  0x76   : > { %1045 = vmatpush.msrb.mxu1 %v965_v48 }
  0x78   : > { %1046 = vmatpush.msrb.mxu1 %v964_v54 }
  0x79   : > { %469 = vmatmul.f32.gmra.mxu0 %v355_v9  ;;  %534 = vmatmul.f32.gmra.mxu1 %v355_v9 }
  0x7a   : > { %1047 = vmatpush.msrb.mxu1 %v963_v58 }
  0x7c   : > { %1048 = vmatpush.msrb.mxu1 %v962_v60 }
  0x7d   : > { %496 = vmatmul.f32.gmra.mxu2 %v2042_v10  ;;  %561 = vmatmul.f32.gmra.mxu3 %v2042_v10 }
  0x7e   : > { %1049 = vmatpush.msrb.mxu1 %v961_v63 }
  0x80   : > { %1050 = vmatpush.msrb.mxu1 %v960_v4 }
  0x81   : > { %472 = vmatmul.f32.gmra.mxu0 %v356_v11  ;;  %537 = vmatmul.f32.gmra.mxu1 %v356_v11 }
  0x85   : > { %499 = vmatmul.f32.gmra.mxu2 %v2048_v12  ;;  %564 = vmatmul.f32.gmra.mxu3 %v2048_v12 }
  0x89   : > { %475 = vmatmul.f32.gmra.mxu0 %v357_v13  ;;  %540 = vmatmul.f32.gmra.mxu1 %v357_v13 }
  0x8d   : > { %502 = vmatmul.f32.gmra.mxu2 %v2054_v14  ;;  %567 = vmatmul.f32.gmra.mxu3 %v2054_v14 }
  0x91   : > { %478 = vmatmul.f32.gmra.mxu0 %v358_v15  ;;  %543 = vmatmul.f32.gmra.mxu1 %v358_v15 }
  0x95   : > { %587 = vmatmul.f32.vlgmr.msrb.gmra.mxu2 %v2005_v37  ;;  %652 = vmatmul.f32.vlgmr.msrb.gmra.mxu3 %v2005_v37 }
  0x9d   : > { %590 = vmatmul.f32.gmra.mxu2 %v2015_v47  ;;  %655 = vmatmul.f32.gmra.mxu3 %v2015_v47  ;;  %v949_v47 = vld [vmem:[#allocation9 + $0x40] sm:$0xff] }
  0x9e   : > { %980 = vmatpush.msrb.mxu0 %v949_v47 }
  0xa0   : > { %981 = vmatpush.msrb.mxu0 %v948_v53 }
  0xa5   : > { %593 = vmatmul.f32.gmra.mxu2 %v2025_v57  ;;  %658 = vmatmul.f32.gmra.mxu3 %v2025_v57  ;;  %v947_v57 = vld [vmem:[#allocation9 + $0x30] sm:$0xff] }
  0xa6   : > { %982 = vmatpush.msrb.mxu0 %v947_v57 }
  0xa8   : > { %983 = vmatpush.msrb.mxu0 %v946_v59 }
  0xad   : > { %596 = vmatmul.f32.gmra.mxu2 %v354_v3  ;;  %661 = vmatmul.f32.gmra.mxu3 %v354_v3  ;;  %v944_v3 = vld [vmem:[#allocation9 + $0x18] sm:$0xff] }
  0xb5   : > { %599 = vmatmul.f32.gmra.mxu2 %v355_v9  ;;  %664 = vmatmul.f32.gmra.mxu3 %v355_v9 }
  0xbd   : > { %602 = vmatmul.f32.gmra.mxu2 %v356_v11  ;;  %667 = vmatmul.f32.gmra.mxu3 %v356_v11  ;;  %v943_v11 = vld [vmem:[#allocation9 + $0x10] sm:$0xff] }
  0xc5   : > { %605 = vmatmul.f32.gmra.mxu2 %v357_v13  ;;  %670 = vmatmul.f32.gmra.mxu3 %v357_v13  ;;  %v959_v13 = vld [vmem:[#allocation9 + $0x90] sm:$0xff] }
  0xc6   : > { %1051 = vmatpush.msrb.mxu1 %v959_v13 }
  0xc8   : > { %1052 = vmatpush.msrb.mxu1 %v958_v17 }
  0xca   : > { %1053 = vmatpush.msrb.mxu1 %v957_v26 }
  0xcd   : > { %608 = vmatmul.f32.gmra.mxu2 %v358_v15  ;;  %673 = vmatmul.f32.gmra.mxu3 %v358_v15 }
  0xd5   : > { %611 = vmatmul.f32.gmra.mxu2 %v2000_v32  ;;  %676 = vmatmul.f32.gmra.mxu3 %v2000_v32 }
  0xd6   : > { %v458_v37 = vpop.f32.mrf.mxu0  ;;  %v523_v38 = vpop.f32.mrf.mxu1 }
  0xd7   : > { %v2108_v61 = vadd.f32 %v458_v37, %v2070_v19  ;;  %v2111_v0 = vadd.f32 %v523_v38, %v2073_v20 }
  0xd8   : > { %v482_v21 = vpop.f32.mrf.mxu2  ;;  %v547_v22 = vpop.f32.mrf.mxu3 }
  0xd9   : > { %v2076_v23 = vadd.f32 %v482_v21, %v2070_v19  ;;  %v2079_v24 = vadd.f32 %v547_v22, %v2073_v20  ;;  %v701_v9 = vsub.f32 0.0, %v2108_v61  ;;  %v702_v15 = vsub.f32 0.0, %v2111_v0 }
  0xdb   : > { %v733_v21 = vmul.f32 1.442695, %v701_v9  ;;  %v735_v27 = vmul.f32 1.442695, %v702_v15  ;;  %v2173_v15 = vperm.slane %v2065_v18, 2 }
  0xdd   : > { %614 = vmatmul.f32.gmra.mxu2 %v2010_v42  ;;  %679 = vmatmul.f32.gmra.mxu3 %v2010_v42  ;;  %1477 = vpow2.f32 %v733_v21 }
  0xde   : > { %v461_v49 = vpop.f32.mrf.mxu0  ;;  %v526_v50 = vpop.f32.mrf.mxu1  ;;  %1479 = vpow2.f32 %v735_v27 }
  0xdf   : > { %v2124_v22 = vadd.f32 %v461_v49, %v2070_v19  ;;  %v2127_v28 = vadd.f32 %v526_v50, %v2073_v20 }
  0xe0   : > { %v485_v29 = vpop.f32.mrf.mxu2  ;;  %v550_v30 = vpop.f32.mrf.mxu3 }
  0xe1   : > { %v2084_v31 = vadd.f32 %v485_v29, %v2070_v19  ;;  %v2087_v32 = vadd.f32 %v550_v30, %v2073_v20  ;;  %v703_v34 = vsub.f32 0.0, %v2124_v22  ;;  %v704_v35 = vsub.f32 0.0, %v2127_v28 }
  0xe3   : > { %v1478_v44 = vpop.eup %1477 }
  0xe4   : > { %v1480_v47 = vpop.eup %1479 }
  0xe5   : > { %617 = vmatmul.f32.gmra.mxu2 %v2020_v52  ;;  %682 = vmatmul.f32.gmra.mxu3 %v2020_v52 }
  0xe6   : > { %v464_v7 = vpop.f32.mrf.mxu0 }
  0xe7   : > { %v2138_v38 = vadd.f32 %v464_v7, %v2070_v19 }
  0xe8   : > { %v488_v39 = vpop.f32.mrf.mxu2  ;;  %v553_v40 = vpop.f32.mrf.mxu3 }
  0xe9   : > { %v2092_v41 = vadd.f32 %v488_v39, %v2070_v19  ;;  %v2095_v42 = vadd.f32 %v553_v40, %v2073_v20  ;;  %v737_v39 = vmul.f32 1.442695, %v703_v34  ;;  %v739_v40 = vmul.f32 1.442695, %v704_v35 }
  0xea   : > { %v705_v48 = vsub.f32 0.0, %v2138_v38 }
  0xeb   : > { %1481 = vpow2.f32 %v737_v39 }
  0xec   : > { %1483 = vpow2.f32 %v739_v40  ;;  %v741_v53 = vmul.f32 1.442695, %v705_v48 }
  0xed   : > { %620 = vmatmul.f32.gmra.mxu2 %v2030_v62  ;;  %685 = vmatmul.f32.gmra.mxu3 %v2030_v62  ;;  %v945_v62 = vld [vmem:[#allocation9 + $0x20] sm:$0xff] }
  0xee   : > { %984 = vmatpush.msrb.mxu0 %v945_v62  ;;  %v467_v36 = vpop.f32.mrf.mxu0 }
  0xef   : > { %v2156_v58 = vadd.f32 %v467_v36, %v2070_v19 }
  0xf0   : > { %v491_v51 = vpop.f32.mrf.mxu2  ;;  %v556_v52 = vpop.f32.mrf.mxu3  ;;  %985 = vmatpush.msrb.mxu0 %v944_v3 }
  0xf1   : > { %v2100_v55 = vadd.f32 %v491_v51, %v2070_v19  ;;  %v2103_v56 = vadd.f32 %v556_v52, %v2073_v20  ;;  %v797_v51 = vadd.f32 1.0, %v1478_v44  ;;  %v798_v52 = vadd.f32 1.0, %v1480_v47  ;;  %v1482_v62 = vpop.eup %1481 }
  0xf2   : > { %986 = vmatpush.msrb.mxu0 %v943_v11  ;;  %v707_v4 = vsub.f32 0.0, %v2156_v58  ;;  %v799_v7 = vadd.f32 1.0, %v1482_v62 }
  0xf3   : > { %1485 = vrcp.f32 %v797_v51 }
  0xf4   : > { %987 = vmatpush.msrb.mxu0 %v942_v16  ;;  %1487 = vrcp.f32 %v798_v52  ;;  %v2176_v16 = vperm.slane %v2065_v18, 3  ;;  %v745_v21 = vmul.f32 1.442695, %v707_v4 }
  0xf5   : > { %623 = vmatmul.f32.gmra.mxu2 %v2036_v8  ;;  %688 = vmatmul.f32.gmra.mxu3 %v2036_v8  ;;  %v529_v8 = vpop.f32.mrf.mxu1  ;;  %1489 = vpow2.f32 %v741_v53 }
  0xf6   : > { %988 = vmatpush.msrb.mxu0 %v941_v25  ;;  %v2143_v43 = vadd.f32 %v529_v8, %v2073_v20  ;;  %v470_v54 = vpop.f32.mrf.mxu0 }
  0xf7   : > { %v2170_v13 = vadd.f32 %v470_v54, %v2070_v19 }
  0xf8   : > { %v494_v1 = vpop.f32.mrf.mxu2  ;;  %v559_v2 = vpop.f32.mrf.mxu3 }
  0xf9   : > { %v2114_v5 = vadd.f32 %v494_v1, %v2070_v19  ;;  %v2117_v6 = vadd.f32 %v559_v2, %v2073_v20  ;;  %v1484_v2 = vpop.eup %1483  ;;  %v709_v18 = vsub.f32 0.0, %v2170_v13 }
  0xfa   : > { %v800_v9 = vadd.f32 1.0, %v1484_v2  ;;  %v1486_v11 = vpop.eup %1485 }
  0xfb   : > { %v1488_v17 = vpop.eup %1487  ;;  %v861_v34 = vmul.f32 %v1486_v11, %v2108_v61 }
  0xfc   : > { %v1490_v25 = vpop.eup %1489  ;;  %v862_v39 = vmul.f32 %v1488_v17, %v2111_v0 }
  0xfd   : > { %626 = vmatmul.f32.gmra.mxu2 %v2042_v10  ;;  %691 = vmatmul.f32.gmra.mxu3 %v2042_v10  ;;  %v532_v37 = vpop.f32.mrf.mxu1 }
  0xfe   : > { %v2159_v60 = vadd.f32 %v532_v37, %v2073_v20 }
 0x100   : > { %v497_v29 = vpop.f32.mrf.mxu2  ;;  %v562_v30 = vpop.f32.mrf.mxu3  ;;  %v708_v8 = vsub.f32 0.0, %v2159_v60 }
 0x101   : > { %v2130_v33 = vadd.f32 %v497_v29, %v2070_v19  ;;  %v2133_v10 = vadd.f32 %v562_v30, %v2073_v20  ;;  %v473_v29 = vpop.f32.mrf.mxu0 }
 0x102   : > { %v747_v26 = vmul.f32 1.442695, %v708_v8  ;;  %v2188_v0 = vadd.f32 %v473_v29, %v2070_v19 }
 0x104   : > { %v711_v11 = vsub.f32 0.0, %v2188_v0 }
 0x105   : > { %629 = vmatmul.f32.gmra.mxu2 %v2048_v12  ;;  %694 = vmatmul.f32.gmra.mxu3 %v2048_v12  ;;  %v706_v12 = vsub.f32 0.0, %v2143_v43  ;;  %v535_v57 = vpop.f32.mrf.mxu1 }
 0x106   : > { %v2179_v27 = vadd.f32 %v535_v57, %v2073_v20 }
 0x107   : > { %v743_v59 = vmul.f32 1.442695, %v706_v12  ;;  %v749_v12 = vmul.f32 1.442695, %v709_v18 }
 0x108   : > { %v500_v45 = vpop.f32.mrf.mxu2  ;;  %v565_v46 = vpop.f32.mrf.mxu3 }
 0x109   : > { %v2147_v49 = vadd.f32 %v500_v45, %v2070_v19  ;;  %v2150_v50 = vadd.f32 %v565_v46, %v2073_v20  ;;  %1491 = vpow2.f32 %v743_v59  ;;  %v801_v45 = vadd.f32 1.0, %v1490_v25  ;;  %v476_v4 = vpop.f32.mrf.mxu0 }
 0x10a   : > { %1493 = vrcp.f32 %v799_v7  ;;  %v710_v46 = vsub.f32 0.0, %v2179_v27 }
 0x10b   : > { %1495 = vrcp.f32 %v800_v9 }
 0x10c   : > { %1497 = vpow2.f32 %v745_v21  ;;  %v751_v54 = vmul.f32 1.442695, %v710_v46 }
 0x10d   : > { %632 = vmatmul.f32.gmra.mxu2 %v2054_v14  ;;  %697 = vmatmul.f32.gmra.mxu3 %v2054_v14  ;;  %v538_v30 = vpop.f32.mrf.mxu1  ;;  %1499 = vpow2.f32 %v747_v26 }
 0x10e   : > { %v2191_v53 = vadd.f32 %v538_v30, %v2073_v20  ;;  %1501 = vrcp.f32 %v801_v45  ;;  %v753_v30 = vmul.f32 1.442695, %v711_v11 }
 0x10f   : > { %v1492_v37 = vpop.eup %1491 }
 0x110   : > { %v503_v63 = vpop.f32.mrf.mxu2  ;;  %v568_v1 = vpop.f32.mrf.mxu3  ;;  %v802_v61 = vadd.f32 1.0, %v1492_v37  ;;  %v712_v17 = vsub.f32 0.0, %v2191_v53 }
 0x111   : > { %v2162_v3 = vadd.f32 %v503_v63, %v2070_v19  ;;  %v2165_v14 = vadd.f32 %v568_v1, %v2073_v20  ;;  %v1494_v51 = vpop.eup %1493 }
 0x112   : > { %v1496_v52 = vpop.eup %1495  ;;  %v863_v59 = vmul.f32 %v1494_v51, %v2124_v22  ;;  %1503 = vrcp.f32 %v802_v61 }
 0x113   : > { %v1498_v57 = vpop.eup %1497  ;;  %v864_v2 = vmul.f32 %v1496_v52, %v2127_v28  ;;  %1505 = vpow2.f32 %v749_v12  ;;  %v479_v12 = vpop.f32.mrf.mxu0 }
 0x114   : > { %v1500_v1 = vpop.eup %1499  ;;  %v803_v21 = vadd.f32 1.0, %v1498_v57  ;;  %1507 = vpow2.f32 %v751_v54 }
 0x115   : > { %v541_v7 = vpop.f32.mrf.mxu1  ;;  %v804_v26 = vadd.f32 1.0, %v1500_v1  ;;  %v1502_v29 = vpop.eup %1501 }
 0x116   : > { %1509 = vrcp.f32 %v803_v21  ;;  %v2203_v37 = vadd.f32 %v541_v7, %v2073_v20 }
 0x117   : > { %1511 = vrcp.f32 %v804_v26 }
 0x118   : > { %v588_v35 = vpop.f32.mrf.mxu2  ;;  %v653_v36 = vpop.f32.mrf.mxu3  ;;  %1513 = vpow2.f32 %v753_v30  ;;  %v714_v51 = vsub.f32 0.0, %v2203_v37 }
 0x119   : > { %v589_v40 = vadd.f32 %v588_v35, %v2173_v15  ;;  %v654_v44 = vadd.f32 %v653_v36, %v2176_v16  ;;  %v1504_v28 = vpop.eup %1503  ;;  %v755_v36 = vmul.f32 1.442695, %v712_v17 }
 0x11a   : > { %v1506_v35 = vpop.eup %1505  ;;  %v866_v45 = vmul.f32 %v1504_v28, %v2143_v43 }
 0x11b   : > { %v893_v47 = vmul.f32 %v861_v34, %v589_v40  ;;  %v894_v48 = vmul.f32 %v862_v39, %v654_v44  ;;  %v2200_v34 = vadd.f32 %v476_v4, %v2070_v19  ;;  %v1508_v40 = vpop.eup %1507  ;;  %v865_v44 = vmul.f32 %v1502_v29, %v2138_v38 }
 0x11c   : > { %1515 = vpow2.f32 %v755_v36 }
 0x11d   : > { %989 = vmatmul.f32.vlgmr.msrb.gmra.mxu0 %v893_v47  ;;  %1054 = vmatmul.f32.vlgmr.msrb.gmra.mxu1 %v894_v48  ;;  %v805_v48 = vadd.f32 1.0, %v1506_v35  ;;  %v713_v61 = vsub.f32 0.0, %v2200_v34  ;;  %v544_v52 = vpop.f32.mrf.mxu1 }
 0x11e   : > { %v2215_v1 = vadd.f32 %v544_v52, %v2073_v20 }
 0x11f   : > { %v757_v43 = vmul.f32 1.442695, %v713_v61  ;;  %1517 = vrcp.f32 %v805_v48 }
 0x120   : > { %v591_v62 = vpop.f32.mrf.mxu2  ;;  %v656_v63 = vpop.f32.mrf.mxu3  ;;  %v716_v20 = vsub.f32 0.0, %v2215_v1 }
 0x121   : > { %v592_v8 = vadd.f32 %v591_v62, %v2173_v15  ;;  %v657_v9 = vadd.f32 %v656_v63, %v2176_v16  ;;  %v1510_v62 = vpop.eup %1509  ;;  %v2212_v63 = vadd.f32 %v479_v12, %v2070_v19 }
 0x122   : > { %v1512_v38 = vpop.eup %1511  ;;  %v867_v11 = vmul.f32 %v1510_v62, %v2156_v58  ;;  %v763_v36 = vmul.f32 1.442695, %v716_v20 }
 0x123   : > { %v895_v22 = vmul.f32 %v863_v59, %v592_v8  ;;  %v896_v25 = vmul.f32 %v864_v2, %v657_v9  ;;  %v806_v59 = vadd.f32 1.0, %v1508_v40  ;;  %v759_v2 = vmul.f32 1.442695, %v714_v51  ;;  %v1514_v4 = vpop.eup %1513 }
 0x124   : > { %v1516_v9 = vpop.eup %1515  ;;  %v868_v17 = vmul.f32 %v1512_v38, %v2159_v60  ;;  %v715_v19 = vsub.f32 0.0, %v2212_v63  ;;  %v717_v60 = vsub.f32 0.0, %v2076_v23  ;;  %v718_v51 = vsub.f32 0.0, %v2079_v24 }
 0x125   : > { %992 = vmatmul.f32.gmra.mxu0 %v895_v22  ;;  %1057 = vmatmul.f32.gmra.mxu1 %v896_v25  ;;  %1519 = vrcp.f32 %v806_v59  ;;  %v807_v25 = vadd.f32 1.0, %v1514_v4  ;;  %v808_v28 = vadd.f32 1.0, %v1516_v9  ;;  %v1518_v30 = vpop.eup %1517  ;;  %v720_v38 = vsub.f32 0.0, %v2087_v32 }
 0x126   : > { %1521 = vpow2.f32 %v757_v43  ;;  %v761_v35 = vmul.f32 1.442695, %v715_v19  ;;  %v765_v61 = vmul.f32 1.442695, %v717_v60 }
 0x127   : > { %1523 = vpow2.f32 %v759_v2 }
 0x128   : > { %v594_v39 = vpop.f32.mrf.mxu2  ;;  %v659_v18 = vpop.f32.mrf.mxu3  ;;  %1525 = vrcp.f32 %v807_v25 }
 0x129   : > { %v595_v46 = vadd.f32 %v594_v39, %v2173_v15  ;;  %v660_v47 = vadd.f32 %v659_v18, %v2176_v16  ;;  %1527 = vrcp.f32 %v808_v28 }
 0x12a   : > { %1529 = vpow2.f32 %v761_v35 }
 0x12b   : > { %v897_v54 = vmul.f32 %v865_v44, %v595_v46  ;;  %v898_v57 = vmul.f32 %v866_v45, %v660_v47  ;;  %v1520_v58 = vpop.eup %1519  ;;  %v869_v45 = vmul.f32 %v1518_v30, %v2170_v13  ;;  %1531 = vpow2.f32 %v763_v36 }
 0x12c   : > { %v1522_v39 = vpop.eup %1521  ;;  %v870_v46 = vmul.f32 %v1520_v58, %v2179_v27  ;;  %1533 = vpow2.f32 %v765_v61  ;;  %v767_v27 = vmul.f32 1.442695, %v718_v51 }
 0x12d   : > { %995 = vmatmul.f32.gmra.mxu0 %v897_v54  ;;  %1060 = vmatmul.f32.gmra.mxu1 %v898_v57  ;;  %v1524_v44 = vpop.eup %1523  ;;  %v809_v12 = vadd.f32 1.0, %v1522_v39  ;;  %v719_v57 = vsub.f32 0.0, %v2084_v31 }
 0x12e   : > { %v810_v59 = vadd.f32 1.0, %v1524_v44  ;;  %v1526_v62 = vpop.eup %1525 }
 0x12f   : > { %v1528_v13 = vpop.eup %1527  ;;  %1535 = vrcp.f32 %v809_v12  ;;  %v769_v2 = vmul.f32 1.442695, %v719_v57  ;;  %v871_v9 = vmul.f32 %v1526_v62, %v2188_v0 }
 0x130   : > { %v597_v7 = vpop.f32.mrf.mxu2  ;;  %v662_v8 = vpop.f32.mrf.mxu3  ;;  %1537 = vrcp.f32 %v810_v59 }
 0x131   : > { %v598_v21 = vadd.f32 %v597_v7, %v2173_v15  ;;  %v663_v22 = vadd.f32 %v662_v8, %v2176_v16  ;;  %v1530_v43 = vpop.eup %1529  ;;  %1539 = vpow2.f32 %v767_v27 }
 0x132   : > { %v1532_v8 = vpop.eup %1531  ;;  %v811_v19 = vadd.f32 1.0, %v1530_v43  ;;  %1541 = vpow2.f32 %v769_v2  ;;  %v724_v2 = vsub.f32 0.0, %v2103_v56 }
 0x133   : > { %v899_v26 = vmul.f32 %v867_v11, %v598_v21  ;;  %v900_v29 = vmul.f32 %v868_v17, %v663_v22  ;;  %v872_v11 = vmul.f32 %v1528_v13, %v2191_v53  ;;  %v771_v22 = vmul.f32 1.442695, %v720_v38 }
 0x134   : > { %v721_v53 = vsub.f32 0.0, %v2092_v41 }
 0x135   : > { %998 = vmatmul.f32.gmra.mxu0 %v899_v26  ;;  %1063 = vmatmul.f32.gmra.mxu1 %v900_v29  ;;  %v1534_v26 = vpop.eup %1533  ;;  %v812_v29 = vadd.f32 1.0, %v1532_v8  ;;  %1543 = vpow2.f32 %v771_v22 }
 0x136   : > { %v1536_v28 = vpop.eup %1535  ;;  %1545 = vrcp.f32 %v811_v19  ;;  %v773_v51 = vmul.f32 1.442695, %v721_v53 }
 0x137   : > { %v1538_v30 = vpop.eup %1537  ;;  %1547 = vrcp.f32 %v812_v29  ;;  %v873_v35 = vmul.f32 %v1536_v28, %v2200_v34 }
 0x138   : > { %v600_v18 = vpop.f32.mrf.mxu2  ;;  %v665_v40 = vpop.f32.mrf.mxu3  ;;  %v874_v36 = vmul.f32 %v1538_v30, %v2203_v37  ;;  %v723_v37 = vsub.f32 0.0, %v2100_v55  ;;  %v726_v30 = vsub.f32 0.0, %v2117_v6 }
 0x139   : > { %v601_v47 = vadd.f32 %v600_v18, %v2173_v15  ;;  %v666_v48 = vadd.f32 %v665_v40, %v2176_v16  ;;  %v1540_v0 = vpop.eup %1539  ;;  %v813_v40 = vadd.f32 1.0, %v1534_v26 }
 0x13a   : > { %v1542_v44 = vpop.eup %1541 }
 0x13b   : > { %v901_v52 = vmul.f32 %v869_v45, %v601_v47  ;;  %v902_v54 = vmul.f32 %v870_v46, %v666_v48  ;;  %v814_v45 = vadd.f32 1.0, %v1540_v0  ;;  %v722_v46 = vsub.f32 0.0, %v2095_v42  ;;  %v1544_v61 = vpop.eup %1543 }
 0x13c   : > { %v1546_v12 = vpop.eup %1545  ;;  %1549 = vrcp.f32 %v813_v40  ;;  %v815_v38 = vadd.f32 1.0, %v1542_v44  ;;  %v816_v43 = vadd.f32 1.0, %v1544_v61 }
 0x13d   : > { %1001 = vmatmul.f32.gmra.mxu0 %v901_v52  ;;  %1066 = vmatmul.f32.gmra.mxu1 %v902_v54  ;;  %v1548_v52 = vpop.eup %1547  ;;  %1551 = vrcp.f32 %v814_v45  ;;  %v775_v34 = vmul.f32 1.442695, %v722_v46  ;;  %v875_v59 = vmul.f32 %v1546_v12, %v2212_v63  ;;  %v779_v63 = vmul.f32 1.442695, %v724_v2 }
 0x13e   : > { %1553 = vpow2.f32 %v773_v51  ;;  %v876_v62 = vmul.f32 %v1548_v52, %v2215_v1  ;;  %v727_v46 = vsub.f32 0.0, %v2130_v33  ;;  %v728_v51 = vsub.f32 0.0, %v2133_v10 }
 0x13f   : > { %1555 = vpow2.f32 %v775_v34 }
 0x140   : > { %v603_v4 = vpop.f32.mrf.mxu2  ;;  %v668_v7 = vpop.f32.mrf.mxu3  ;;  %1557 = vrcp.f32 %v815_v38 }
 0x141   : > { %v604_v17 = vadd.f32 %v603_v4, %v2173_v15  ;;  %v669_v21 = vadd.f32 %v668_v7, %v2176_v16  ;;  %1559 = vrcp.f32 %v816_v43 }
 0x142   : > { %v1550_v8 = vpop.eup %1549 }
 0x143   : > { %v903_v20 = vmul.f32 %v871_v9, %v604_v17  ;;  %v904_v25 = vmul.f32 %v872_v11, %v669_v21  ;;  %v1552_v9 = vpop.eup %1551  ;;  %v777_v11 = vmul.f32 1.442695, %v723_v37  ;;  %v877_v1 = vmul.f32 %v1550_v8, %v2076_v23 }
 0x144   : > { %v1554_v17 = vpop.eup %1553  ;;  %v878_v21 = vmul.f32 %v1552_v9, %v2079_v24  ;;  %v730_v8 = vsub.f32 0.0, %v2150_v50 }
 0x145   : > { %1004 = vmatmul.f32.gmra.mxu0 %v903_v20  ;;  %1069 = vmatmul.f32.gmra.mxu1 %v904_v25  ;;  %v1556_v20 = vpop.eup %1555  ;;  %1561 = vpow2.f32 %v777_v11  ;;  %v725_v25 = vsub.f32 0.0, %v2114_v5  ;;  %v817_v28 = vadd.f32 1.0, %v1554_v17 }
 0x146   : > { %1563 = vpow2.f32 %v779_v63  ;;  %v818_v23 = vadd.f32 1.0, %v1556_v20 }
 0x147   : > { %v781_v24 = vmul.f32 1.442695, %v725_v25  ;;  %1565 = vrcp.f32 %v817_v28 }
 0x148   : > { %v606_v58 = vpop.f32.mrf.mxu2  ;;  %v671_v60 = vpop.f32.mrf.mxu3  ;;  %1567 = vrcp.f32 %v818_v23 }
 0x149   : > { %v607_v39 = vadd.f32 %v606_v58, %v2173_v15  ;;  %v672_v18 = vadd.f32 %v671_v60, %v2176_v16  ;;  %v1558_v58 = vpop.eup %1557  ;;  %1569 = vpow2.f32 %v781_v24 }
 0x14a   : > { %v1560_v60 = vpop.eup %1559 }
 0x14b   : > { %v905_v47 = vmul.f32 %v873_v35, %v607_v39  ;;  %v906_v48 = vmul.f32 %v874_v36, %v672_v18  ;;  %v1562_v35 = vpop.eup %1561  ;;  %v783_v36 = vmul.f32 1.442695, %v726_v30  ;;  %v879_v39 = vmul.f32 %v1558_v58, %v2084_v31 }
 0x14c   : > { %v880_v18 = vmul.f32 %v1560_v60, %v2087_v32  ;;  %v1564_v45 = vpop.eup %1563  ;;  %v819_v61 = vadd.f32 1.0, %v1562_v35  ;;  %v785_v32 = vmul.f32 1.442695, %v727_v46 }
 0x14d   : > { %1007 = vmatmul.f32.gmra.mxu0 %v905_v47  ;;  %1072 = vmatmul.f32.gmra.mxu1 %v906_v48  ;;  %1571 = vpow2.f32 %v783_v36  ;;  %v820_v31 = vadd.f32 1.0, %v1564_v45  ;;  %v1566_v34 = vpop.eup %1565 }
 0x14e   : > { %v1568_v37 = vpop.eup %1567  ;;  %1573 = vrcp.f32 %v819_v61 }
 0x14f   : > { %1575 = vrcp.f32 %v820_v31  ;;  %v882_v38 = vmul.f32 %v1568_v37, %v2095_v42 }
 0x150   : > { %v609_v54 = vpop.f32.mrf.mxu2  ;;  %v674_v57 = vpop.f32.mrf.mxu3  ;;  %1577 = vpow2.f32 %v785_v32 }
 0x151   : > { %v610_v13 = vadd.f32 %v609_v54, %v2173_v15  ;;  %v675_v27 = vadd.f32 %v674_v57, %v2176_v16  ;;  %v1570_v54 = vpop.eup %1569  ;;  %v787_v57 = vmul.f32 1.442695, %v728_v51 }
 0x153   : > { %v907_v4 = vmul.f32 %v875_v59, %v610_v13  ;;  %v908_v7 = vmul.f32 %v876_v62, %v675_v27  ;;  %v881_v59 = vmul.f32 %v1566_v34, %v2092_v41  ;;  %v1572_v27 = vpop.eup %1571  ;;  %1579 = vpow2.f32 %v787_v57 }
 0x154   : > { %v822_v41 = vadd.f32 1.0, %v1572_v27  ;;  %v1574_v17 = vpop.eup %1573 }
 0x155   : > { %1010 = vmatmul.f32.gmra.mxu0 %v907_v4  ;;  %1075 = vmatmul.f32.gmra.mxu1 %v908_v7  ;;  %v821_v4 = vadd.f32 1.0, %v1570_v54  ;;  %v729_v7 = vsub.f32 0.0, %v2147_v49  ;;  %v1576_v63 = vpop.eup %1575  ;;  %v883_v25 = vmul.f32 %v1574_v17, %v2100_v55 }
 0x156   : > { %v1578_v42 = vpop.eup %1577 }
 0x157   : > { %1581 = vrcp.f32 %v821_v4  ;;  %v823_v30 = vadd.f32 1.0, %v1578_v42 }
 0x158   : > { %v612_v22 = vpop.f32.mrf.mxu2  ;;  %v677_v19 = vpop.f32.mrf.mxu3  ;;  %1583 = vrcp.f32 %v822_v41 }
 0x159   : > { %v613_v26 = vadd.f32 %v612_v22, %v2173_v15  ;;  %v678_v29 = vadd.f32 %v677_v19, %v2176_v16  ;;  %v1580_v20 = vpop.eup %1579 }
 0x15a   : > { %v824_v60 = vadd.f32 1.0, %v1580_v20 }
 0x15b   : > { %v909_v0 = vmul.f32 %v877_v1, %v613_v26  ;;  %v910_v53 = vmul.f32 %v878_v21, %v678_v29  ;;  %v789_v1 = vmul.f32 1.442695, %v729_v7  ;;  %v791_v21 = vmul.f32 1.442695, %v730_v8 }
 0x15c   : > { %v884_v26 = vmul.f32 %v1576_v63, %v2103_v56 }
 0x15d   : > { %1013 = vmatmul.f32.gmra.mxu0 %v909_v0  ;;  %1078 = vmatmul.f32.gmra.mxu1 %v910_v53  ;;  %1585 = vpow2.f32 %v789_v1  ;;  %v731_v0 = vsub.f32 0.0, %v2162_v3  ;;  %v732_v53 = vsub.f32 0.0, %v2165_v14  ;;  %v1582_v24 = vpop.eup %1581 }
 0x15e   : > { %1587 = vpow2.f32 %v791_v21  ;;  %v1584_v55 = vpop.eup %1583 }
 0x15f   : > { %v793_v35 = vmul.f32 1.442695, %v731_v0  ;;  %1589 = vrcp.f32 %v823_v30  ;;  %v795_v56 = vmul.f32 1.442695, %v732_v53  ;;  %v886_v45 = vmul.f32 %v1584_v55, %v2117_v6 }
 0x160   : > { %v615_v40 = vpop.f32.mrf.mxu2  ;;  %v680_v44 = vpop.f32.mrf.mxu3  ;;  %1591 = vrcp.f32 %v824_v60 }
 0x161   : > { %v616_v47 = vadd.f32 %v615_v40, %v2173_v15  ;;  %v681_v48 = vadd.f32 %v680_v44, %v2176_v16  ;;  %v885_v44 = vmul.f32 %v1582_v24, %v2114_v5  ;;  %1593 = vpow2.f32 %v793_v35 }
 0x162   : > { %1595 = vpow2.f32 %v795_v56 }
 0x163   : > { %v911_v12 = vmul.f32 %v879_v39, %v616_v47  ;;  %v912_v52 = vmul.f32 %v880_v18, %v681_v48  ;;  %v1586_v36 = vpop.eup %1585 }
 0x164   : > { %v1588_v40 = vpop.eup %1587  ;;  %v825_v48 = vadd.f32 1.0, %v1586_v36 }
 0x165   : > { %1016 = vmatmul.f32.gmra.mxu0 %v911_v12  ;;  %1081 = vmatmul.f32.gmra.mxu1 %v912_v52  ;;  %v826_v12 = vadd.f32 1.0, %v1588_v40  ;;  %v1590_v52 = vpop.eup %1589 }
 0x166   : > { %v1592_v31 = vpop.eup %1591  ;;  %1597 = vrcp.f32 %v825_v48  ;;  %v887_v37 = vmul.f32 %v1590_v52, %v2130_v33 }
 0x167   : > { %v1594_v34 = vpop.eup %1593  ;;  %1599 = vrcp.f32 %v826_v12  ;;  %v888_v54 = vmul.f32 %v1592_v31, %v2133_v10 }
 0x168   : > { %v618_v62 = vpop.f32.mrf.mxu2  ;;  %v683_v13 = vpop.f32.mrf.mxu3 }
 0x169   : > { %v619_v43 = vadd.f32 %v618_v62, %v2173_v15  ;;  %v684_v2 = vadd.f32 %v683_v13, %v2176_v16  ;;  %v1596_v6 = vpop.eup %1595  ;;  %v827_v62 = vadd.f32 1.0, %v1594_v34 }
 0x16b   : > { %v913_v9 = vmul.f32 %v881_v59, %v619_v43  ;;  %v914_v11 = vmul.f32 %v882_v38, %v684_v2  ;;  %v828_v38 = vadd.f32 1.0, %v1596_v6  ;;  %1601 = vrcp.f32 %v827_v62 }
 0x16c   : > { %v1598_v43 = vpop.eup %1597 }
 0x16d   : > { %1019 = vmatmul.f32.gmra.mxu0 %v913_v9  ;;  %1084 = vmatmul.f32.gmra.mxu1 %v914_v11  ;;  %v1600_v2 = vpop.eup %1599  ;;  %1603 = vrcp.f32 %v828_v38  ;;  %v889_v33 = vmul.f32 %v1598_v43, %v2147_v49 }
 0x16e   : > { %v890_v10 = vmul.f32 %v1600_v2, %v2150_v50 }
 0x170   : > { %v621_v22 = vpop.f32.mrf.mxu2  ;;  %v686_v19 = vpop.f32.mrf.mxu3 }
 0x171   : > { %v622_v29 = vadd.f32 %v621_v22, %v2173_v15  ;;  %v687_v28 = vadd.f32 %v686_v19, %v2176_v16  ;;  %v1602_v17 = vpop.eup %1601 }
 0x172   : > { %v891_v21 = vmul.f32 %v1602_v17, %v2162_v3 }
 0x173   : > { %v915_v58 = vmul.f32 %v883_v25, %v622_v29  ;;  %v916_v23 = vmul.f32 %v884_v26, %v687_v28  ;;  %v1604_v63 = vpop.eup %1603  ;;  %v2290_v25 = vld [vmem:[%s2371_s4] ss:$0 sm:$0xff] }
 0x174   : > { %v892_v22 = vmul.f32 %v1604_v63, %v2165_v14 }
 0x175   : > { %1022 = vmatmul.f32.gmra.mxu0 %v915_v58  ;;  %1087 = vmatmul.f32.gmra.mxu1 %v916_v23 }
 0x178   : > { %v624_v39 = vpop.f32.mrf.mxu2  ;;  %v689_v18 = vpop.f32.mrf.mxu3 }
 0x179   : > { %v625_v46 = vadd.f32 %v624_v39, %v2173_v15  ;;  %v690_v47 = vadd.f32 %v689_v18, %v2176_v16 }
 0x17b   : > { %v917_v61 = vmul.f32 %v885_v44, %v625_v46  ;;  %v918_v51 = vmul.f32 %v886_v45, %v690_v47 }
 0x17d   : > { %1025 = vmatmul.f32.gmra.mxu0 %v917_v61  ;;  %1090 = vmatmul.f32.gmra.mxu1 %v918_v51 }
 0x180   : > { %v627_v5 = vpop.f32.mrf.mxu2  ;;  %v692_v32 = vpop.f32.mrf.mxu3 }
 0x181   : > { %v628_v57 = vadd.f32 %v627_v5, %v2173_v15  ;;  %v693_v59 = vadd.f32 %v692_v32, %v2176_v16 }
 0x183   : > { %v919_v13 = vmul.f32 %v887_v37, %v628_v57  ;;  %v920_v27 = vmul.f32 %v888_v54, %v693_v59 }
 0x185   : > { %1028 = vmatmul.f32.gmra.mxu0 %v919_v13  ;;  %1093 = vmatmul.f32.gmra.mxu1 %v920_v27 }
 0x188   : > { %v630_v4 = vpop.f32.mrf.mxu2  ;;  %v695_v7 = vpop.f32.mrf.mxu3 }
 0x189   : > { %v631_v8 = vadd.f32 %v630_v4, %v2173_v15  ;;  %v696_v9 = vadd.f32 %v695_v7, %v2176_v16 }
 0x18b   : > { %v921_v11 = vmul.f32 %v889_v33, %v631_v8  ;;  %v922_v41 = vmul.f32 %v890_v10, %v696_v9 }
 0x18d   : > { %1031 = vmatmul.f32.gmra.mxu0 %v921_v11  ;;  %1096 = vmatmul.f32.gmra.mxu1 %v922_v41 }
 0x190   : > { %v633_v1 = vpop.f32.mrf.mxu2  ;;  %v698_v42 = vpop.f32.mrf.mxu3 }
 0x191   : > { %v634_v49 = vadd.f32 %v633_v1, %v2173_v15  ;;  %v699_v50 = vadd.f32 %v698_v42, %v2176_v16 }
 0x193   : > { %v923_v19 = vmul.f32 %v891_v21, %v634_v49  ;;  %v924_v20 = vmul.f32 %v892_v22, %v699_v50 }
 0x195   : > { %1034 = vmatmul.f32.gmra.mxu0 %v923_v19  ;;  %1099 = vmatmul.f32.gmra.mxu1 %v924_v20 }
 0x19a   : > { %v990_v26 = vpop.f32.mrf.mxu0  ;;  %v1055_v29 = vpop.f32.mrf.mxu1 }
 0x19b   : > { %v1056_v28 = vadd.f32 %v1055_v29, %v990_v26 }
 0x19d   : > { %v1158_v3 = vadd.f32 %v2290_v25, %v1056_v28 }
 0x19f   : > { %1174 = vst [vmem:[%s2295_s3] sm:$0xff] %v1158_v3 }
 0x1a2   : > { %v993_v14 = vpop.f32.mrf.mxu0  ;;  %v1058_v15 = vpop.f32.mrf.mxu1 }
 0x1a3   : > { %v1059_v16 = vadd.f32 %v1058_v15, %v993_v14 }
 0x1a5   : > { %v1159_v30 = vadd.f32 %v2290_v25, %v1059_v16 }
 0x1a7   : > { %1175 = vst [vmem:[%s2295_s3 + $0x8] sm:$0xff] %v1159_v30 }
 0x1aa   : > { %v996_v0 = vpop.f32.mrf.mxu0  ;;  %v1061_v53 = vpop.f32.mrf.mxu1 }
 0x1ab   : > { %v1062_v58 = vadd.f32 %v1061_v53, %v996_v0 }
 0x1ad   : > { %v1160_v23 = vadd.f32 %v2290_v25, %v1062_v58 }
 0x1af   : > { %1176 = vst [vmem:[%s2295_s3 + $0x10] sm:$0xff] %v1160_v23 }
 0x1b2   : > { %v999_v60 = vpop.f32.mrf.mxu0  ;;  %v1064_v24 = vpop.f32.mrf.mxu1 }
 0x1b3   : > { %v1065_v55 = vadd.f32 %v1064_v24, %v999_v60 }
 0x1b5   : > { %v1161_v35 = vadd.f32 %v2290_v25, %v1065_v55 }
 0x1b7   : > { %1177 = vst [vmem:[%s2295_s3 + $0x18] sm:$0xff] %v1161_v35 }
 0x1ba   : > { %v1002_v56 = vpop.f32.mrf.mxu0  ;;  %v1067_v36 = vpop.f32.mrf.mxu1 }
 0x1bb   : > { %v1068_v39 = vadd.f32 %v1067_v36, %v1002_v56 }
 0x1bd   : > { %v1162_v18 = vadd.f32 %v2290_v25, %v1068_v39 }
 0x1bf   : > { %1178 = vst [vmem:[%s2295_s3 + $0x20] sm:$0xff] %v1162_v18 }
 0x1c2   : > { %v1005_v40 = vpop.f32.mrf.mxu0  ;;  %v1070_v44 = vpop.f32.mrf.mxu1 }
 0x1c3   : > { %v1071_v45 = vadd.f32 %v1070_v44, %v1005_v40 }
 0x1c5   : > { %v1163_v46 = vadd.f32 %v2290_v25, %v1071_v45 }
 0x1c7   : > { %1179 = vst [vmem:[%s2295_s3 + $0x28] sm:$0xff] %v1163_v46 }
 0x1ca   : > { %v1008_v47 = vpop.f32.mrf.mxu0  ;;  %v1073_v48 = vpop.f32.mrf.mxu1 }
 0x1cb   : > { %v1074_v61 = vadd.f32 %v1073_v48, %v1008_v47 }
 0x1cd   : > { %v1164_v51 = vadd.f32 %v2290_v25, %v1074_v61 }
 0x1cf   : > { %1180 = vst [vmem:[%s2295_s3 + $0x30] sm:$0xff] %v1164_v51 }
 0x1d2   : > { %v1011_v12 = vpop.f32.mrf.mxu0  ;;  %v1076_v52 = vpop.f32.mrf.mxu1 }
 0x1d3   : > { %v1077_v31 = vadd.f32 %v1076_v52, %v1011_v12 }
 0x1d5   : > { %v1165_v34 = vadd.f32 %v2290_v25, %v1077_v31 }
 0x1d7   : > { %1181 = vst [vmem:[%s2295_s3 + $0x38] sm:$0xff] %v1165_v34 }
 0x1da   : > { %v1014_v5 = vpop.f32.mrf.mxu0  ;;  %v1079_v32 = vpop.f32.mrf.mxu1 }
 0x1db   : > { %v1080_v6 = vadd.f32 %v1079_v32, %v1014_v5 }
 0x1dd   : > { %v1166_v37 = vadd.f32 %v2290_v25, %v1080_v6 }
 0x1df   : > { %1182 = vst [vmem:[%s2295_s3 + $0x40] sm:$0xff] %v1166_v37 }
 0x1e2   : > { %v1017_v54 = vpop.f32.mrf.mxu0  ;;  %v1082_v57 = vpop.f32.mrf.mxu1 }
 0x1e3   : > { %v1083_v59 = vadd.f32 %v1082_v57, %v1017_v54 }
 0x1e5   : > { %v1167_v62 = vadd.f32 %v2290_v25, %v1083_v59 }
 0x1e7   : > { %1183 = vst [vmem:[%s2295_s3 + $0x48] sm:$0xff] %v1167_v62 }
 0x1ea   : > { %v1020_v13 = vpop.f32.mrf.mxu0  ;;  %v1085_v27 = vpop.f32.mrf.mxu1 }
 0x1eb   : > { %v1086_v38 = vadd.f32 %v1085_v27, %v1020_v13 }
 0x1ed   : > { %v1168_v43 = vadd.f32 %v2290_v25, %v1086_v38 }
 0x1ef   : > { %1184 = vst [vmem:[%s2295_s3 + $0x50] sm:$0xff] %v1168_v43 }
 0x1f2   : > { %v1023_v2 = vpop.f32.mrf.mxu0  ;;  %v1088_v4 = vpop.f32.mrf.mxu1 }
 0x1f3   : > { %v1089_v7 = vadd.f32 %v1088_v4, %v1023_v2 }
 0x1f5   : > { %v1169_v33 = vadd.f32 %v2290_v25, %v1089_v7 }
 0x1f7   : > { %1185 = vst [vmem:[%s2295_s3 + $0x58] sm:$0xff] %v1169_v33 }
 0x1fa   : > { %v1026_v10 = vpop.f32.mrf.mxu0  ;;  %v1091_v8 = vpop.f32.mrf.mxu1 }
 0x1fb   : > { %v1092_v9 = vadd.f32 %v1091_v8, %v1026_v10 }
 0x1fd   : > { %v1170_v11 = vadd.f32 %v2290_v25, %v1092_v9 }
 0x1ff   : > { %1186 = vst [vmem:[%s2295_s3 + $0x60] sm:$0xff] %v1170_v11 }
 0x202   : > { %v1029_v41 = vpop.f32.mrf.mxu0  ;;  %v1094_v17 = vpop.f32.mrf.mxu1 }
 0x203   : > { %v1095_v63 = vadd.f32 %v1094_v17, %v1029_v41 }
 0x205   : > { %v1171_v1 = vadd.f32 %v2290_v25, %v1095_v63 }
 0x207   : > { %1187 = vst [vmem:[%s2295_s3 + $0x68] sm:$0xff] %v1171_v1 }
 0x20a   : > { %v1032_v42 = vpop.f32.mrf.mxu0  ;;  %v1097_v21 = vpop.f32.mrf.mxu1 }
 0x20b   : > { %v1098_v22 = vadd.f32 %v1097_v21, %v1032_v42 }
 0x20d   : > { %v1172_v49 = vadd.f32 %v2290_v25, %v1098_v22 }
 0x20f   : > { %1188 = vst [vmem:[%s2295_s3 + $0x70] sm:$0xff] %v1172_v49 }
 0x212   : > { %v1035_v50 = vpop.f32.mrf.mxu0  ;;  %v1100_v19 = vpop.f32.mrf.mxu1 }
 0x213   : > { %v1101_v20 = vadd.f32 %v1100_v19, %v1035_v50 }
 0x215   : > { %v1173_v26 = vadd.f32 %v2290_v25, %v1101_v20 }
 0x217   : > { %1189 = vst [vmem:[%s2295_s3 + $0x78] sm:$0xff] %v1173_v26 }
 0x218   : > { %1752 = shalt.err (!%p1749_p0)
}
 0x219   : > { %s1824_s10 = smov 128   ;;  %s1825_s11 = smov 8  }
 0x21a   : > { %1391 = dma.vmem_to_hbm [thread:$0]  (%p1948_p3), %s1204_s7, 2048, %s1206_s16, %s1191_s25, %s1824_s10, %s1824_s10, %s1825_s11  }
 0x21b PF: > { %s1220_s1 = sand.u32 1, %s1795_s18   ;;  %p1408_p5 = pnand %p1328_p11, %p1905_p6 }
 0x21c   : > { %s1221_s2 = scalar_lea.sflag [#allocation5], %s1220_s1 }
 0x21d   : > { %p1409_p7 = pneg %p1408_p5 }
 0x21f   : > { %1790 = dma.done.wait (%p1409_p7), %s1221_s2, 2048  }
 0x220   : > { %1792 = vsyncadd (%p1409_p7), %s1221_s2, 4294965248  ;;  %s23_s23 = sadd.s32 1, %s1815_s23   ;;  %s2391_s18 = smov %s1799_s19 }
 0x221   : > { %p20_p9 = scmp.ge.s32.totalorder %s23_s23, 4   ;;  %s2392_s19 = smov %s1803_s20 }
 0x222   : > { %s2393_s20 = smov %s1964_s27  ;;  %s2394_s21 = smov %s1811_s22 }
 0x223   : > { %s2395_s22 = smov %s2397_s15  ;;  %22 = sbr.rel (!%p20_p9) target bundleno = 12 (0xc), region = 108 }
 0x228   :  { %1227 = vsyncpa [#allocation4], 1 }
 0x229   :  { %1229 = vsyncpa [#allocation4 + $0x1], 1 }
 0x22a   :  { %1230 = vsyncpa [#allocation7], 1 }
 0x22b   :  { %1231 = vsyncpa [#allocation10], 1 }
 0x22c   :  { %1232 = vsyncpa [#allocation5], 1 }
 0x22d   :  { %1234 = vsyncpa [#allocation5 + $0x1], 1 }

</bundles_post_ra>
